<compile_context>
chip_gen: v7x
topology: tpu7x:2x2x1
jax: 0.10.0
libtpu: 0.0.40
codegen_flags: <defaults>
</compile_context>

<pallas_src>
from collections import namedtuple
import functools

import jax
import jax.numpy as jnp
from jax.experimental import pallas as pl
from jax.experimental.pallas import tpu as pltpu

loss_dict = namedtuple(
    'loss_dict',
    ['dyn_recon_loss', 'constraint_recon_loss', 'dyn_loss', 'constraint_loss',
     'constraint_reg_loss', 'connect_loss', 's', 'u'])


# ----------------------------------------------------------------------------
# Fused forward kernel
# ----------------------------------------------------------------------------

def _traj_opt_kernel(
    # data
    x_ref, goal_ref, u_mppi_ref, eps_dyn_ref, eps_con_ref,
    onehot_ref, embed_ref,
    # vae_dynamics params
    d_ew1, d_eb1, d_ew2, d_eb2, d_dw1, d_db1, d_dw2, d_db2,
    # vae_constraint params
    c_ew1, c_eb1, c_ew2, c_eb2, c_dw1, c_db1, c_dw2, c_db2,
    # latent linear dynamics (A_full^T, B_full^T) and injected GT dynamics
    a_full_t_ref, b_full_t_ref, wgt_x_ref, wgt_u_ref,
    # output: 8 scalar loss components
    out_ref,
    *, nz, n_steps, batch):
    f32 = jnp.float32

    def mlp2(a, w1_ref, b1_ref, w2_ref, b2_ref):
        h = jnp.dot(a, w1_ref[...], preferred_element_type=f32) + b1_ref[...]
        h = jnp.maximum(h, 0.0)
        return jnp.dot(h, w2_ref[...], preferred_element_type=f32) + b2_ref[...]

    x = x_ref[...]
    goal = goal_ref[...]
    xg = jnp.concatenate([x, goal], axis=0)                       # (2B, nx)

    # ---- encodes: x and goal batched into one matmul per VAE ---------------
    mlv_d = mlp2(xg, d_ew1, d_eb1, d_ew2, d_eb2)                  # (2B, 2nz)
    mu_d, lv_d = mlv_d[:, :nz], mlv_d[:, nz:]
    z_d = mu_d + jnp.exp(0.5 * lv_d) * eps_dyn_ref[...]

    mlv_c = mlp2(xg, c_ew1, c_eb1, c_ew2, c_eb2)
    mu_c, lv_c = mlv_c[:, :nz], mlv_c[:, nz:]
    z_c = mu_c + jnp.exp(0.5 * lv_c) * eps_con_ref[...]

    # ---- reconstruction losses (4 decodes batched 2+2) ---------------------
    xh_d = mlp2(z_d, d_dw1, d_db1, d_dw2, d_db2)                  # (2B, nx)
    xh_c = mlp2(z_c, c_dw1, c_db1, c_dw2, c_db2)

    inv_rows = 1.0 / float(xg.shape[0])

    def vae_loss(target, recon, mu, lv):
        diff = recon - target
        rec = jnp.sum(diff * diff) * inv_rows
        kl = -0.5 * jnp.sum(1.0 + lv - mu * mu - jnp.exp(lv)) * inv_rows
        return rec + kl

    dyn_recon_raw = vae_loss(xg, xh_d, mu_d, lv_d)
    con_recon_raw = vae_loss(xg, xh_c, mu_c, lv_c)

    # ---- constraint embedding (one-hot @ table) + regularizer --------------
    cz = jnp.dot(onehot_ref[...], embed_ref[...],
                 preferred_element_type=f32)                      # (B*K, ncz)
    reg_raw = jnp.sum(cz * cz) / float(cz.shape[0])
    # TODO(synk): E/F/b from constraint_predictor_constraint feed only the
    # undefined QPControllerLayer and therefore are not computed here.

    # ---- ground-truth rollout under u_mppi (torch.no_grad branch) ----------
    wgt_x = wgt_x_ref[...]
    wgt_u = wgt_u_ref[...]
    xs = [x]
    for i in range(n_steps):
        u_i = u_mppi_ref[i]                                       # (B, nu)
        xs.append(jnp.dot(xs[-1], wgt_x, preferred_element_type=f32)
                  + jnp.dot(u_i, wgt_u, preferred_element_type=f32))
    gt_all = jnp.concatenate(xs, axis=0)                          # ((N+1)B, nx)

    # ---- learned latent rollout (dynamics_loss) -----------------------------
    a_t = a_full_t_ref[...]                                       # (2nz, 2nz)
    b_t = b_full_t_ref[...]                                       # (nu, 2nz)
    z_full0 = jnp.concatenate([z_d[:batch], z_c[:batch]], axis=1)  # (B, 2nz)
    zr = [z_full0]
    for i in range(n_steps):
        u_i = u_mppi_ref[i]
        zr.append(jnp.dot(zr[-1], a_t, preferred_element_type=f32)
                  + jnp.dot(u_i, b_t, preferred_element_type=f32))
    zroll = jnp.concatenate(zr, axis=0)                           # ((N+1)B, 2nz)
    z_dyn_roll = zroll[:, :nz]

    # encode GT rollout with the dynamics VAE (all N+1 steps in one matmul)
    z_gt = mlp2(gt_all, d_ew1, d_eb1, d_ew2, d_eb2)[:, :nz]
    d_enc = z_dyn_roll - z_gt
    rollout_loss_enc = jnp.mean(d_enc * d_enc)
    x_traj = mlp2(z_dyn_roll, d_dw1, d_db1, d_dw2, d_db2)         # ((N+1)B, nx)
    d_dyn = x_traj - gt_all
    dyn_raw = jnp.mean(d_dyn * d_dyn) + rollout_loss_enc

    # ---- controller placeholder ---------------------------------------------
    # TODO(synk): QPControllerLayer.solve (external differentiable QP over the
    # horizon) is undefined; placeholder uses u = 0, s = 0 and a zero-control
    # latent rollout of [mu, mu_constraint] as the constraint trajectory.
    zf = [jnp.concatenate([mu_d[:batch], mu_c[:batch]], axis=1)]
    for i in range(n_steps):
        zf.append(jnp.dot(zf[-1], a_t, preferred_element_type=f32))
    z_con_traj = jnp.concatenate(zf, axis=0)[:, nz:]              # ((N+1)B, nz)
    x_traj_con = mlp2(z_con_traj, c_dw1, c_db1, c_dw2, c_db2)     # ((N+1)B, nx)

    d_cn = x_traj - x_traj_con
    connect_raw = jnp.mean(d_cn * d_cn)

    def ring_violation(pts):
        xy = pts[:, :2]
        nrm = jnp.sqrt(jnp.sum(xy * xy, axis=1, keepdims=True))
        return jnp.maximum(10.0 - nrm, 0.0)                       # (rows, 1)

    viol_plan = ring_violation(x_traj_con)

    # second GT rollout under the controller's u (placeholder u = 0)
    xs2 = [x]
    for i in range(n_steps):
        xs2.append(jnp.dot(xs2[-1], wgt_x, preferred_element_type=f32))
    gt2_all = jnp.concatenate(xs2, axis=0)
    viol_gt = ring_violation(gt2_all)

    # relu(-s) terms are identically 0 with the placeholder s = 0.
    constraint_raw = jnp.mean(viol_plan) + jnp.mean(viol_gt)

    zero = jnp.zeros((), f32)
    out_ref[0, 0] = dyn_recon_raw
    out_ref[0, 1] = con_recon_raw
    out_ref[0, 2] = dyn_raw
    out_ref[0, 3] = constraint_raw
    out_ref[0, 4] = reg_raw
    out_ref[0, 5] = connect_raw
    out_ref[0, 6] = zero      # relu(-s).mean()   (placeholder s = 0)
    out_ref[0, 7] = zero      # ||u||.mean()      (placeholder u = 0)


# ----------------------------------------------------------------------------
# Parameters & wrapper
# ----------------------------------------------------------------------------

def init_params(key, config):
    nx, nu, nz = config['nx'], config['nu'], config['nz']
    nh, ncz = config['nhidden'], config['ncz']
    V = config['num_constraints'] + 2
    ks = jax.random.split(key, 16)
    s = 0.05

    def lin(k, din, dout):
        return s * jax.random.normal(k, (din, dout), jnp.float32)

    emb = 0.1 * jax.random.normal(ks[12], (V, ncz), jnp.float32)
    emb = emb.at[0].set(0.0)   # padding_idx=0

    return dict(
        dyn_ew1=lin(ks[0], nx, nh), dyn_eb1=jnp.zeros((1, nh), jnp.float32),
        dyn_ew2=lin(ks[1], nh, 2 * nz), dyn_eb2=jnp.zeros((1, 2 * nz), jnp.float32),
        dyn_dw1=lin(ks[2], nz, nh), dyn_db1=jnp.zeros((1, nh), jnp.float32),
        dyn_dw2=lin(ks[3], nh, nx), dyn_db2=jnp.zeros((1, nx), jnp.float32),
        con_ew1=lin(ks[4], nx, nh), con_eb1=jnp.zeros((1, nh), jnp.float32),
        con_ew2=lin(ks[5], nh, 2 * nz), con_eb2=jnp.zeros((1, 2 * nz), jnp.float32),
        con_dw1=lin(ks[6], nz, nh), con_db1=jnp.zeros((1, nh), jnp.float32),
        con_dw2=lin(ks[7], nh, nx), con_db2=jnp.zeros((1, nx), jnp.float32),
        embedding=emb,
        A=0.01 * jax.random.normal(ks[8], (nz, nz), jnp.float32),
        A_constraint=0.01 * jax.random.normal(ks[9], (nz, nz), jnp.float32),
        B=0.01 * jax.random.normal(ks[10], (nz, nu), jnp.float32),
        B_constraint=0.01 * jax.random.normal(ks[11], (nz, nu), jnp.float32),
        # injected ground-truth dynamics (constructor argument in the reference)
        gt_Wx=jnp.eye(nx, dtype=jnp.float32)
              + 0.02 * jax.random.normal(ks[13], (nx, nx), jnp.float32),
        gt_Wu=0.1 * jax.random.normal(ks[14], (nu, nx), jnp.float32),
    )


def traj_opt_forward(params, config, x, goal, u_mppi, x_t, constraint_idx, rng_key):
    """Equivalent of TrajOptModel.forward -> (loss, losses)."""
    del x_t  # accepted for API parity; the reference loss() never reads it.
    B = x.shape[0]
    nz = config['nz']
    N = u_mppi.shape[1]
    V = config['num_constraints'] + 2
    K = constraint_idx.shape[1]

    k_d, k_c = jax.random.split(rng_key, 2)
    eps_dyn = jax.random.normal(k_d, (2 * B, nz), jnp.float32)
    eps_con = jax.random.normal(k_c, (2 * B, nz), jnp.float32)

    onehot = jax.nn.one_hot(constraint_idx, V, dtype=jnp.float32).reshape(B * K, V)

    # Parameter-only assembly (done once): A = blockdiag(A, A_con) + I, B = [B; B_con]
    a_full = jnp.eye(2 * nz, dtype=jnp.float32)
    a_full = a_full.at[:nz, :nz].add(params['A']).at[nz:, nz:].add(params['A_constraint'])
    b_full = jnp.concatenate([params['B'], params['B_constraint']], axis=0)   # (2nz, nu)

    u_sb = jnp.transpose(u_mppi, (1, 0, 2))    # (N, B, nu): step-major for in-kernel slicing

    p = params
    inputs = (
        x, goal, u_sb, eps_dyn, eps_con, onehot, p['embedding'],
        p['dyn_ew1'], p['dyn_eb1'], p['dyn_ew2'], p['dyn_eb2'],
        p['dyn_dw1'], p['dyn_db1'], p['dyn_dw2'], p['dyn_db2'],
        p['con_ew1'], p['con_eb1'], p['con_ew2'], p['con_eb2'],
        p['con_dw1'], p['con_db1'], p['con_dw2'], p['con_db2'],
        a_full.T, b_full.T, p['gt_Wx'], p['gt_Wu'],
    )

    kernel = functools.partial(_traj_opt_kernel, nz=nz, n_steps=N, batch=B)
    vmem = pl.BlockSpec(memory_space=pltpu.MemorySpace.VMEM)
    smem = pl.BlockSpec(memory_space=pltpu.MemorySpace.SMEM)
    raw = pl.pallas_call(
        kernel,
        out_shape=jax.ShapeDtypeStruct((1, 8), jnp.float32),
        in_specs=[vmem] * len(inputs),
        out_specs=smem,
    )(*inputs)[0]

    dyn_recon_raw = raw[0]
    con_recon_raw = raw[1]
    dyn_raw = raw[2]
    constraint_raw = raw[3]
    reg_raw = raw[4]
    connect_raw = raw[5]
    s_metric = raw[6]
    u_metric = raw[7]

    lam_rec = config['lambda_recon']
    recon_loss = lam_rec * dyn_recon_raw + lam_rec * con_recon_raw
    dyn_loss = config['lambda_dyn'] * dyn_raw
    constraint_loss = config['lambda_constraint'] * constraint_raw
    constraint_reg_loss = config['lambda_reg'] * reg_raw
    connect_loss = config['lambda_connect'] * connect_raw

    loss = recon_loss + dyn_loss + constraint_loss + constraint_reg_loss + connect_loss
    losses = loss_dict(
        dyn_recon_loss=dyn_recon_raw,
        constraint_recon_loss=con_recon_raw,
        dyn_loss=dyn_raw,
        constraint_loss=constraint_raw,
        constraint_reg_loss=reg_raw,
        connect_loss=connect_raw,
        s=s_metric,
        u=u_metric)
    return loss, losses


# ----------------------------------------------------------------------------
# main
# ----------------------------------------------------------------------------

if __name__ == "__main__":
    config = dict(nx=8, nu=4, nz=4, nhidden=32, ncz=8, num_constraints=3,
                  N=5, local=False, num_dyn_samples=1,
                  lambda_recon=1.0, lambda_dyn=0.1, lambda_constraint=0.1,
                  lambda_reg=0.01, lambda_connect=0.1)

    root = jax.random.PRNGKey(0)
    kp, kx, kg, ku, kxt, kc, keps = jax.random.split(root, 7)
    params = init_params(kp, config)

    B = 8
    x = jax.random.normal(kx, (B, config['nx']), jnp.float32)
    goal = jax.random.normal(kg, (B, config['nx']), jnp.float32)
    u_mppi = jax.random.normal(ku, (B, config['N'], config['nu']), jnp.float32)
    x_t = jax.random.normal(kxt, (B, config['N'], config['nx']), jnp.float32)
    constraint_idx = jax.random.randint(
        kc, (B, config['num_constraints'] + 1), 0, config['num_constraints'] + 2)

    fwd = jax.jit(functools.partial(traj_opt_forward, params, config))
    loss, losses = fwd(x, goal, u_mppi, x_t, constraint_idx, keps)
    jax.block_until_ready(loss)
    jax.block_until_ready(losses.dyn_recon_loss)
    jax.block_until_ready(losses.constraint_loss)
    print("KERNEL_OK")
</pallas_src>

<mosaic_0001>
module attributes {stable_mosaic.version = 11 : i64} {
  func.func @_traj_opt_kernel(%arg0: memref<8x8xf32, #tpu.memory_space<vmem>>, %arg1: memref<8x8xf32, #tpu.memory_space<vmem>>, %arg2: memref<5x8x4xf32, #tpu.memory_space<vmem>>, %arg3: memref<16x4xf32, #tpu.memory_space<vmem>>, %arg4: memref<16x4xf32, #tpu.memory_space<vmem>>, %arg5: memref<32x5xf32, #tpu.memory_space<vmem>>, %arg6: memref<5x8xf32, #tpu.memory_space<vmem>>, %arg7: memref<8x32xf32, #tpu.memory_space<vmem>>, %arg8: memref<1x32xf32, #tpu.memory_space<vmem>>, %arg9: memref<32x8xf32, #tpu.memory_space<vmem>>, %arg10: memref<1x8xf32, #tpu.memory_space<vmem>>, %arg11: memref<4x32xf32, #tpu.memory_space<vmem>>, %arg12: memref<1x32xf32, #tpu.memory_space<vmem>>, %arg13: memref<32x8xf32, #tpu.memory_space<vmem>>, %arg14: memref<1x8xf32, #tpu.memory_space<vmem>>, %arg15: memref<8x32xf32, #tpu.memory_space<vmem>>, %arg16: memref<1x32xf32, #tpu.memory_space<vmem>>, %arg17: memref<32x8xf32, #tpu.memory_space<vmem>>, %arg18: memref<1x8xf32, #tpu.memory_space<vmem>>, %arg19: memref<4x32xf32, #tpu.memory_space<vmem>>, %arg20: memref<1x32xf32, #tpu.memory_space<vmem>>, %arg21: memref<32x8xf32, #tpu.memory_space<vmem>>, %arg22: memref<1x8xf32, #tpu.memory_space<vmem>>, %arg23: memref<8x8xf32, #tpu.memory_space<vmem>>, %arg24: memref<4x8xf32, #tpu.memory_space<vmem>>, %arg25: memref<8x8xf32, #tpu.memory_space<vmem>>, %arg26: memref<4x8xf32, #tpu.memory_space<vmem>>, %arg27: memref<1x8xf32, #tpu.memory_space<smem>>) attributes {dimension_semantics = [], scalar_prefetch = 0 : i64, scratch_operands = 0 : i64, tpu.core_type = #tpu.core_type<tc>} {
    %c0 = arith.constant 0 : index
    %c0_0 = arith.constant 0 : index
    %0 = vector.load %arg0[%c0, %c0_0] : memref<8x8xf32, #tpu.memory_space<vmem>>, vector<8x8xf32>
    %c0_1 = arith.constant 0 : index
    %c0_2 = arith.constant 0 : index
    %1 = vector.load %arg1[%c0_1, %c0_2] : memref<8x8xf32, #tpu.memory_space<vmem>>, vector<8x8xf32>
    %2 = tpu.concatenate %0, %1 in 0 : vector<8x8xf32>, vector<8x8xf32> -> vector<16x8xf32>
    %c0_3 = arith.constant 0 : index
    %c0_4 = arith.constant 0 : index
    %3 = vector.load %arg7[%c0_3, %c0_4] : memref<8x32xf32, #tpu.memory_space<vmem>>, vector<8x32xf32>
    %cst = arith.constant dense<0.000000e+00> : vector<16x32xf32>
    %4 = tpu.matmul %2, %3, %cst {dimension_numbers = #tpu.dot_dimension_numbers<[1], [0], [0], [1], [0, 0, 1, 1], [], []>} : vector<16x8xf32>, vector<8x32xf32>, vector<16x32xf32> -> vector<16x32xf32>
    %c0_5 = arith.constant 0 : index
    %c0_6 = arith.constant 0 : index
    %5 = vector.load %arg8[%c0_5, %c0_6] : memref<1x32xf32, #tpu.memory_space<vmem>>, vector<1x32xf32>
    %6 = vector.broadcast %5 : vector<1x32xf32> to vector<16x32xf32>
    %7 = arith.addf %4, %6 : vector<16x32xf32>
    %cst_7 = arith.constant 0.000000e+00 : f32
    %8 = vector.broadcast %cst_7 : f32 to vector<16x32xf32>
    %9 = arith.maximumf %7, %8 : vector<16x32xf32>
    %c0_8 = arith.constant 0 : index
    %c0_9 = arith.constant 0 : index
    %10 = vector.load %arg9[%c0_8, %c0_9] : memref<32x8xf32, #tpu.memory_space<vmem>>, vector<32x8xf32>
    %cst_10 = arith.constant dense<0.000000e+00> : vector<16x8xf32>
    %11 = tpu.matmul %9, %10, %cst_10 {dimension_numbers = #tpu.dot_dimension_numbers<[1], [0], [0], [1], [0, 0, 1, 1], [], []>} : vector<16x32xf32>, vector<32x8xf32>, vector<16x8xf32> -> vector<16x8xf32>
    %c0_11 = arith.constant 0 : index
    %c0_12 = arith.constant 0 : index
    %12 = vector.load %arg10[%c0_11, %c0_12] : memref<1x8xf32, #tpu.memory_space<vmem>>, vector<1x8xf32>
    %13 = vector.broadcast %12 : vector<1x8xf32> to vector<16x8xf32>
    %14 = arith.addf %11, %13 : vector<16x8xf32>
    %15 = vector.extract_strided_slice %14 {offsets = [0, 0], sizes = [16, 4], strides = [1, 1]} : vector<16x8xf32> to vector<16x4xf32>
    %16 = vector.extract_strided_slice %14 {offsets = [0, 4], sizes = [16, 4], strides = [1, 1]} : vector<16x8xf32> to vector<16x4xf32>
    %cst_13 = arith.constant 5.000000e-01 : f32
    %17 = vector.broadcast %cst_13 : f32 to vector<16x4xf32>
    %18 = arith.mulf %17, %16 : vector<16x4xf32>
    %19 = math.exp %18 : vector<16x4xf32>
    %c0_14 = arith.constant 0 : index
    %c0_15 = arith.constant 0 : index
    %20 = vector.load %arg3[%c0_14, %c0_15] : memref<16x4xf32, #tpu.memory_space<vmem>>, vector<16x4xf32>
    %21 = arith.mulf %19, %20 : vector<16x4xf32>
    %22 = arith.addf %15, %21 : vector<16x4xf32>
    %c0_16 = arith.constant 0 : index
    %c0_17 = arith.constant 0 : index
    %23 = vector.load %arg15[%c0_16, %c0_17] : memref<8x32xf32, #tpu.memory_space<vmem>>, vector<8x32xf32>
    %cst_18 = arith.constant dense<0.000000e+00> : vector<16x32xf32>
    %24 = tpu.matmul %2, %23, %cst_18 {dimension_numbers = #tpu.dot_dimension_numbers<[1], [0], [0], [1], [0, 0, 1, 1], [], []>} : vector<16x8xf32>, vector<8x32xf32>, vector<16x32xf32> -> vector<16x32xf32>
    %c0_19 = arith.constant 0 : index
    %c0_20 = arith.constant 0 : index
    %25 = vector.load %arg16[%c0_19, %c0_20] : memref<1x32xf32, #tpu.memory_space<vmem>>, vector<1x32xf32>
    %26 = vector.broadcast %25 : vector<1x32xf32> to vector<16x32xf32>
    %27 = arith.addf %24, %26 : vector<16x32xf32>
    %cst_21 = arith.constant 0.000000e+00 : f32
    %28 = vector.broadcast %cst_21 : f32 to vector<16x32xf32>
    %29 = arith.maximumf %27, %28 : vector<16x32xf32>
    %c0_22 = arith.constant 0 : index
    %c0_23 = arith.constant 0 : index
    %30 = vector.load %arg17[%c0_22, %c0_23] : memref<32x8xf32, #tpu.memory_space<vmem>>, vector<32x8xf32>
    %cst_24 = arith.constant dense<0.000000e+00> : vector<16x8xf32>
    %31 = tpu.matmul %29, %30, %cst_24 {dimension_numbers = #tpu.dot_dimension_numbers<[1], [0], [0], [1], [0, 0, 1, 1], [], []>} : vector<16x32xf32>, vector<32x8xf32>, vector<16x8xf32> -> vector<16x8xf32>
    %c0_25 = arith.constant 0 : index
    %c0_26 = arith.constant 0 : index
    %32 = vector.load %arg18[%c0_25, %c0_26] : memref<1x8xf32, #tpu.memory_space<vmem>>, vector<1x8xf32>
    %33 = vector.broadcast %32 : vector<1x8xf32> to vector<16x8xf32>
    %34 = arith.addf %31, %33 : vector<16x8xf32>
    %35 = vector.extract_strided_slice %34 {offsets = [0, 0], sizes = [16, 4], strides = [1, 1]} : vector<16x8xf32> to vector<16x4xf32>
    %36 = vector.extract_strided_slice %34 {offsets = [0, 4], sizes = [16, 4], strides = [1, 1]} : vector<16x8xf32> to vector<16x4xf32>
    %cst_27 = arith.constant 5.000000e-01 : f32
    %37 = vector.broadcast %cst_27 : f32 to vector<16x4xf32>
    %38 = arith.mulf %37, %36 : vector<16x4xf32>
    %39 = math.exp %38 : vector<16x4xf32>
    %c0_28 = arith.constant 0 : index
    %c0_29 = arith.constant 0 : index
    %40 = vector.load %arg4[%c0_28, %c0_29] : memref<16x4xf32, #tpu.memory_space<vmem>>, vector<16x4xf32>
    %41 = arith.mulf %39, %40 : vector<16x4xf32>
    %42 = arith.addf %35, %41 : vector<16x4xf32>
    %c0_30 = arith.constant 0 : index
    %c0_31 = arith.constant 0 : index
    %43 = vector.load %arg11[%c0_30, %c0_31] : memref<4x32xf32, #tpu.memory_space<vmem>>, vector<4x32xf32>
    %cst_32 = arith.constant dense<0.000000e+00> : vector<16x32xf32>
    %44 = tpu.matmul %22, %43, %cst_32 {dimension_numbers = #tpu.dot_dimension_numbers<[1], [0], [0], [1], [0, 0, 1, 1], [], []>} : vector<16x4xf32>, vector<4x32xf32>, vector<16x32xf32> -> vector<16x32xf32>
    %c0_33 = arith.constant 0 : index
    %c0_34 = arith.constant 0 : index
    %45 = vector.load %arg12[%c0_33, %c0_34] : memref<1x32xf32, #tpu.memory_space<vmem>>, vector<1x32xf32>
    %46 = vector.broadcast %45 : vector<1x32xf32> to vector<16x32xf32>
    %47 = arith.addf %44, %46 : vector<16x32xf32>
    %cst_35 = arith.constant 0.000000e+00 : f32
    %48 = vector.broadcast %cst_35 : f32 to vector<16x32xf32>
    %49 = arith.maximumf %47, %48 : vector<16x32xf32>
    %c0_36 = arith.constant 0 : index
    %c0_37 = arith.constant 0 : index
    %50 = vector.load %arg13[%c0_36, %c0_37] : memref<32x8xf32, #tpu.memory_space<vmem>>, vector<32x8xf32>
    %cst_38 = arith.constant dense<0.000000e+00> : vector<16x8xf32>
    %51 = tpu.matmul %49, %50, %cst_38 {dimension_numbers = #tpu.dot_dimension_numbers<[1], [0], [0], [1], [0, 0, 1, 1], [], []>} : vector<16x32xf32>, vector<32x8xf32>, vector<16x8xf32> -> vector<16x8xf32>
    %c0_39 = arith.constant 0 : index
    %c0_40 = arith.constant 0 : index
    %52 = vector.load %arg14[%c0_39, %c0_40] : memref<1x8xf32, #tpu.memory_space<vmem>>, vector<1x8xf32>
    %53 = vector.broadcast %52 : vector<1x8xf32> to vector<16x8xf32>
    %54 = arith.addf %51, %53 : vector<16x8xf32>
    %c0_41 = arith.constant 0 : index
    %c0_42 = arith.constant 0 : index
    %55 = vector.load %arg19[%c0_41, %c0_42] : memref<4x32xf32, #tpu.memory_space<vmem>>, vector<4x32xf32>
    %cst_43 = arith.constant dense<0.000000e+00> : vector<16x32xf32>
    %56 = tpu.matmul %42, %55, %cst_43 {dimension_numbers = #tpu.dot_dimension_numbers<[1], [0], [0], [1], [0, 0, 1, 1], [], []>} : vector<16x4xf32>, vector<4x32xf32>, vector<16x32xf32> -> vector<16x32xf32>
    %c0_44 = arith.constant 0 : index
    %c0_45 = arith.constant 0 : index
    %57 = vector.load %arg20[%c0_44, %c0_45] : memref<1x32xf32, #tpu.memory_space<vmem>>, vector<1x32xf32>
    %58 = vector.broadcast %57 : vector<1x32xf32> to vector<16x32xf32>
    %59 = arith.addf %56, %58 : vector<16x32xf32>
    %cst_46 = arith.constant 0.000000e+00 : f32
    %60 = vector.broadcast %cst_46 : f32 to vector<16x32xf32>
    %61 = arith.maximumf %59, %60 : vector<16x32xf32>
    %c0_47 = arith.constant 0 : index
    %c0_48 = arith.constant 0 : index
    %62 = vector.load %arg21[%c0_47, %c0_48] : memref<32x8xf32, #tpu.memory_space<vmem>>, vector<32x8xf32>
    %cst_49 = arith.constant dense<0.000000e+00> : vector<16x8xf32>
    %63 = tpu.matmul %61, %62, %cst_49 {dimension_numbers = #tpu.dot_dimension_numbers<[1], [0], [0], [1], [0, 0, 1, 1], [], []>} : vector<16x32xf32>, vector<32x8xf32>, vector<16x8xf32> -> vector<16x8xf32>
    %c0_50 = arith.constant 0 : index
    %c0_51 = arith.constant 0 : index
    %64 = vector.load %arg22[%c0_50, %c0_51] : memref<1x8xf32, #tpu.memory_space<vmem>>, vector<1x8xf32>
    %65 = vector.broadcast %64 : vector<1x8xf32> to vector<16x8xf32>
    %66 = arith.addf %63, %65 : vector<16x8xf32>
    %67 = arith.subf %54, %2 : vector<16x8xf32>
    %68 = arith.mulf %67, %67 : vector<16x8xf32>
    %69 = vector.shape_cast %68 : vector<16x8xf32> to vector<1x16x8xf32>
    %cst_52 = arith.constant dense<0.000000e+00> : vector<1xf32>
    %70 = vector.multi_reduction <add>, %69, %cst_52 [1, 2] : vector<1x16x8xf32> to vector<1xf32>
    %71 = vector.shape_cast %70 : vector<1xf32> to vector<1x1x1xf32>
    %72 = vector.extract %71[0, 0, 0] : f32 from vector<1x1x1xf32>
    %cst_53 = arith.constant 6.250000e-02 : f32
    %73 = arith.mulf %72, %cst_53 : f32
    %cst_54 = arith.constant 1.000000e+00 : f32
    %74 = vector.broadcast %cst_54 : f32 to vector<16x4xf32>
    %75 = arith.addf %74, %16 : vector<16x4xf32>
    %76 = arith.mulf %15, %15 : vector<16x4xf32>
    %77 = arith.subf %75, %76 : vector<16x4xf32>
    %78 = math.exp %16 : vector<16x4xf32>
    %79 = arith.subf %77, %78 : vector<16x4xf32>
    %80 = vector.shape_cast %79 : vector<16x4xf32> to vector<1x16x4xf32>
    %cst_55 = arith.constant dense<0.000000e+00> : vector<1xf32>
    %81 = vector.multi_reduction <add>, %80, %cst_55 [1, 2] : vector<1x16x4xf32> to vector<1xf32>
    %82 = vector.shape_cast %81 : vector<1xf32> to vector<1x1x1xf32>
    %83 = vector.extract %82[0, 0, 0] : f32 from vector<1x1x1xf32>
    %cst_56 = arith.constant -5.000000e-01 : f32
    %84 = arith.mulf %cst_56, %83 : f32
    %cst_57 = arith.constant 6.250000e-02 : f32
    %85 = arith.mulf %84, %cst_57 : f32
    %86 = arith.addf %73, %85 : f32
    %87 = arith.subf %66, %2 : vector<16x8xf32>
    %88 = arith.mulf %87, %87 : vector<16x8xf32>
    %89 = vector.shape_cast %88 : vector<16x8xf32> to vector<1x16x8xf32>
    %cst_58 = arith.constant dense<0.000000e+00> : vector<1xf32>
    %90 = vector.multi_reduction <add>, %89, %cst_58 [1, 2] : vector<1x16x8xf32> to vector<1xf32>
    %91 = vector.shape_cast %90 : vector<1xf32> to vector<1x1x1xf32>
    %92 = vector.extract %91[0, 0, 0] : f32 from vector<1x1x1xf32>
    %cst_59 = arith.constant 6.250000e-02 : f32
    %93 = arith.mulf %92, %cst_59 : f32
    %cst_60 = arith.constant 1.000000e+00 : f32
    %94 = vector.broadcast %cst_60 : f32 to vector<16x4xf32>
    %95 = arith.addf %94, %36 : vector<16x4xf32>
    %96 = arith.mulf %35, %35 : vector<16x4xf32>
    %97 = arith.subf %95, %96 : vector<16x4xf32>
    %98 = math.exp %36 : vector<16x4xf32>
    %99 = arith.subf %97, %98 : vector<16x4xf32>
    %100 = vector.shape_cast %99 : vector<16x4xf32> to vector<1x16x4xf32>
    %cst_61 = arith.constant dense<0.000000e+00> : vector<1xf32>
    %101 = vector.multi_reduction <add>, %100, %cst_61 [1, 2] : vector<1x16x4xf32> to vector<1xf32>
    %102 = vector.shape_cast %101 : vector<1xf32> to vector<1x1x1xf32>
    %103 = vector.extract %102[0, 0, 0] : f32 from vector<1x1x1xf32>
    %cst_62 = arith.constant -5.000000e-01 : f32
    %104 = arith.mulf %cst_62, %103 : f32
    %cst_63 = arith.constant 6.250000e-02 : f32
    %105 = arith.mulf %104, %cst_63 : f32
    %106 = arith.addf %93, %105 : f32
    %c0_64 = arith.constant 0 : index
    %c0_65 = arith.constant 0 : index
    %107 = vector.load %arg5[%c0_64, %c0_65] : memref<32x5xf32, #tpu.memory_space<vmem>>, vector<32x5xf32>
    %c0_66 = arith.constant 0 : index
    %c0_67 = arith.constant 0 : index
    %108 = vector.load %arg6[%c0_66, %c0_67] : memref<5x8xf32, #tpu.memory_space<vmem>>, vector<5x8xf32>
    %cst_68 = arith.constant dense<0.000000e+00> : vector<32x8xf32>
    %109 = tpu.matmul %107, %108, %cst_68 {dimension_numbers = #tpu.dot_dimension_numbers<[1], [0], [0], [1], [0, 0, 1, 1], [], []>} : vector<32x5xf32>, vector<5x8xf32>, vector<32x8xf32> -> vector<32x8xf32>
    %110 = arith.mulf %109, %109 : vector<32x8xf32>
    %111 = vector.shape_cast %110 : vector<32x8xf32> to vector<1x32x8xf32>
    %cst_69 = arith.constant dense<0.000000e+00> : vector<1xf32>
    %112 = vector.multi_reduction <add>, %111, %cst_69 [1, 2] : vector<1x32x8xf32> to vector<1xf32>
    %113 = vector.shape_cast %112 : vector<1xf32> to vector<1x1x1xf32>
    %114 = vector.extract %113[0, 0, 0] : f32 from vector<1x1x1xf32>
    %cst_70 = arith.constant 3.200000e+01 : f32
    %115 = arith.divf %114, %cst_70 : f32
    %c0_71 = arith.constant 0 : index
    %c0_72 = arith.constant 0 : index
    %116 = vector.load %arg25[%c0_71, %c0_72] : memref<8x8xf32, #tpu.memory_space<vmem>>, vector<8x8xf32>
    %c0_73 = arith.constant 0 : index
    %c0_74 = arith.constant 0 : index
    %117 = vector.load %arg26[%c0_73, %c0_74] : memref<4x8xf32, #tpu.memory_space<vmem>>, vector<4x8xf32>
    %c0_75 = arith.constant 0 : index
    %c0_76 = arith.constant 0 : index
    %c0_77 = arith.constant 0 : index
    %118 = vector.load %arg2[%c0_75, %c0_76, %c0_77] : memref<5x8x4xf32, #tpu.memory_space<vmem>>, vector<1x8x4xf32>
    %119 = vector.shape_cast %118 : vector<1x8x4xf32> to vector<8x4xf32>
    %cst_78 = arith.constant dense<0.000000e+00> : vector<8x8xf32>
    %120 = tpu.matmul %0, %116, %cst_78 {dimension_numbers = #tpu.dot_dimension_numbers<[1], [0], [0], [1], [0, 0, 1, 1], [], []>} : vector<8x8xf32>, vector<8x8xf32>, vector<8x8xf32> -> vector<8x8xf32>
    %cst_79 = arith.constant dense<0.000000e+00> : vector<8x8xf32>
    %121 = tpu.matmul %119, %117, %cst_79 {dimension_numbers = #tpu.dot_dimension_numbers<[1], [0], [0], [1], [0, 0, 1, 1], [], []>} : vector<8x4xf32>, vector<4x8xf32>, vector<8x8xf32> -> vector<8x8xf32>
    %122 = arith.addf %120, %121 : vector<8x8xf32>
    %c1 = arith.constant 1 : index
    %c0_80 = arith.constant 0 : index
    %c0_81 = arith.constant 0 : index
    %123 = vector.load %arg2[%c1, %c0_80, %c0_81] : memref<5x8x4xf32, #tpu.memory_space<vmem>>, vector<1x8x4xf32>
    %124 = vector.shape_cast %123 : vector<1x8x4xf32> to vector<8x4xf32>
    %cst_82 = arith.constant dense<0.000000e+00> : vector<8x8xf32>
    %125 = tpu.matmul %122, %116, %cst_82 {dimension_numbers = #tpu.dot_dimension_numbers<[1], [0], [0], [1], [0, 0, 1, 1], [], []>} : vector<8x8xf32>, vector<8x8xf32>, vector<8x8xf32> -> vector<8x8xf32>
    %cst_83 = arith.constant dense<0.000000e+00> : vector<8x8xf32>
    %126 = tpu.matmul %124, %117, %cst_83 {dimension_numbers = #tpu.dot_dimension_numbers<[1], [0], [0], [1], [0, 0, 1, 1], [], []>} : vector<8x4xf32>, vector<4x8xf32>, vector<8x8xf32> -> vector<8x8xf32>
    %127 = arith.addf %125, %126 : vector<8x8xf32>
    %c2 = arith.constant 2 : index
    %c0_84 = arith.constant 0 : index
    %c0_85 = arith.constant 0 : index
    %128 = vector.load %arg2[%c2, %c0_84, %c0_85] : memref<5x8x4xf32, #tpu.memory_space<vmem>>, vector<1x8x4xf32>
    %129 = vector.shape_cast %128 : vector<1x8x4xf32> to vector<8x4xf32>
    %cst_86 = arith.constant dense<0.000000e+00> : vector<8x8xf32>
    %130 = tpu.matmul %127, %116, %cst_86 {dimension_numbers = #tpu.dot_dimension_numbers<[1], [0], [0], [1], [0, 0, 1, 1], [], []>} : vector<8x8xf32>, vector<8x8xf32>, vector<8x8xf32> -> vector<8x8xf32>
    %cst_87 = arith.constant dense<0.000000e+00> : vector<8x8xf32>
    %131 = tpu.matmul %129, %117, %cst_87 {dimension_numbers = #tpu.dot_dimension_numbers<[1], [0], [0], [1], [0, 0, 1, 1], [], []>} : vector<8x4xf32>, vector<4x8xf32>, vector<8x8xf32> -> vector<8x8xf32>
    %132 = arith.addf %130, %131 : vector<8x8xf32>
    %c3 = arith.constant 3 : index
    %c0_88 = arith.constant 0 : index
    %c0_89 = arith.constant 0 : index
    %133 = vector.load %arg2[%c3, %c0_88, %c0_89] : memref<5x8x4xf32, #tpu.memory_space<vmem>>, vector<1x8x4xf32>
    %134 = vector.shape_cast %133 : vector<1x8x4xf32> to vector<8x4xf32>
    %cst_90 = arith.constant dense<0.000000e+00> : vector<8x8xf32>
    %135 = tpu.matmul %132, %116, %cst_90 {dimension_numbers = #tpu.dot_dimension_numbers<[1], [0], [0], [1], [0, 0, 1, 1], [], []>} : vector<8x8xf32>, vector<8x8xf32>, vector<8x8xf32> -> vector<8x8xf32>
    %cst_91 = arith.constant dense<0.000000e+00> : vector<8x8xf32>
    %136 = tpu.matmul %134, %117, %cst_91 {dimension_numbers = #tpu.dot_dimension_numbers<[1], [0], [0], [1], [0, 0, 1, 1], [], []>} : vector<8x4xf32>, vector<4x8xf32>, vector<8x8xf32> -> vector<8x8xf32>
    %137 = arith.addf %135, %136 : vector<8x8xf32>
    %c4 = arith.constant 4 : index
    %c0_92 = arith.constant 0 : index
    %c0_93 = arith.constant 0 : index
    %138 = vector.load %arg2[%c4, %c0_92, %c0_93] : memref<5x8x4xf32, #tpu.memory_space<vmem>>, vector<1x8x4xf32>
    %139 = vector.shape_cast %138 : vector<1x8x4xf32> to vector<8x4xf32>
    %cst_94 = arith.constant dense<0.000000e+00> : vector<8x8xf32>
    %140 = tpu.matmul %137, %116, %cst_94 {dimension_numbers = #tpu.dot_dimension_numbers<[1], [0], [0], [1], [0, 0, 1, 1], [], []>} : vector<8x8xf32>, vector<8x8xf32>, vector<8x8xf32> -> vector<8x8xf32>
    %cst_95 = arith.constant dense<0.000000e+00> : vector<8x8xf32>
    %141 = tpu.matmul %139, %117, %cst_95 {dimension_numbers = #tpu.dot_dimension_numbers<[1], [0], [0], [1], [0, 0, 1, 1], [], []>} : vector<8x4xf32>, vector<4x8xf32>, vector<8x8xf32> -> vector<8x8xf32>
    %142 = arith.addf %140, %141 : vector<8x8xf32>
    %143 = tpu.concatenate %0, %122, %127, %132, %137, %142 in 0 : vector<8x8xf32>, vector<8x8xf32>, vector<8x8xf32>, vector<8x8xf32>, vector<8x8xf32>, vector<8x8xf32> -> vector<48x8xf32>
    %c0_96 = arith.constant 0 : index
    %c0_97 = arith.constant 0 : index
    %144 = vector.load %arg23[%c0_96, %c0_97] : memref<8x8xf32, #tpu.memory_space<vmem>>, vector<8x8xf32>
    %c0_98 = arith.constant 0 : index
    %c0_99 = arith.constant 0 : index
    %145 = vector.load %arg24[%c0_98, %c0_99] : memref<4x8xf32, #tpu.memory_space<vmem>>, vector<4x8xf32>
    %146 = vector.extract_strided_slice %22 {offsets = [0, 0], sizes = [8, 4], strides = [1, 1]} : vector<16x4xf32> to vector<8x4xf32>
    %147 = vector.extract_strided_slice %42 {offsets = [0, 0], sizes = [8, 4], strides = [1, 1]} : vector<16x4xf32> to vector<8x4xf32>
    %148 = tpu.concatenate %146, %147 in 1 : vector<8x4xf32>, vector<8x4xf32> -> vector<8x8xf32>
    %c0_100 = arith.constant 0 : index
    %c0_101 = arith.constant 0 : index
    %c0_102 = arith.constant 0 : index
    %149 = vector.load %arg2[%c0_100, %c0_101, %c0_102] : memref<5x8x4xf32, #tpu.memory_space<vmem>>, vector<1x8x4xf32>
    %150 = vector.shape_cast %149 : vector<1x8x4xf32> to vector<8x4xf32>
    %cst_103 = arith.constant dense<0.000000e+00> : vector<8x8xf32>
    %151 = tpu.matmul %148, %144, %cst_103 {dimension_numbers = #tpu.dot_dimension_numbers<[1], [0], [0], [1], [0, 0, 1, 1], [], []>} : vector<8x8xf32>, vector<8x8xf32>, vector<8x8xf32> -> vector<8x8xf32>
    %cst_104 = arith.constant dense<0.000000e+00> : vector<8x8xf32>
    %152 = tpu.matmul %150, %145, %cst_104 {dimension_numbers = #tpu.dot_dimension_numbers<[1], [0], [0], [1], [0, 0, 1, 1], [], []>} : vector<8x4xf32>, vector<4x8xf32>, vector<8x8xf32> -> vector<8x8xf32>
    %153 = arith.addf %151, %152 : vector<8x8xf32>
    %c1_105 = arith.constant 1 : index
    %c0_106 = arith.constant 0 : index
    %c0_107 = arith.constant 0 : index
    %154 = vector.load %arg2[%c1_105, %c0_106, %c0_107] : memref<5x8x4xf32, #tpu.memory_space<vmem>>, vector<1x8x4xf32>
    %155 = vector.shape_cast %154 : vector<1x8x4xf32> to vector<8x4xf32>
    %cst_108 = arith.constant dense<0.000000e+00> : vector<8x8xf32>
    %156 = tpu.matmul %153, %144, %cst_108 {dimension_numbers = #tpu.dot_dimension_numbers<[1], [0], [0], [1], [0, 0, 1, 1], [], []>} : vector<8x8xf32>, vector<8x8xf32>, vector<8x8xf32> -> vector<8x8xf32>
    %cst_109 = arith.constant dense<0.000000e+00> : vector<8x8xf32>
    %157 = tpu.matmul %155, %145, %cst_109 {dimension_numbers = #tpu.dot_dimension_numbers<[1], [0], [0], [1], [0, 0, 1, 1], [], []>} : vector<8x4xf32>, vector<4x8xf32>, vector<8x8xf32> -> vector<8x8xf32>
    %158 = arith.addf %156, %157 : vector<8x8xf32>
    %c2_110 = arith.constant 2 : index
    %c0_111 = arith.constant 0 : index
    %c0_112 = arith.constant 0 : index
    %159 = vector.load %arg2[%c2_110, %c0_111, %c0_112] : memref<5x8x4xf32, #tpu.memory_space<vmem>>, vector<1x8x4xf32>
    %160 = vector.shape_cast %159 : vector<1x8x4xf32> to vector<8x4xf32>
    %cst_113 = arith.constant dense<0.000000e+00> : vector<8x8xf32>
    %161 = tpu.matmul %158, %144, %cst_113 {dimension_numbers = #tpu.dot_dimension_numbers<[1], [0], [0], [1], [0, 0, 1, 1], [], []>} : vector<8x8xf32>, vector<8x8xf32>, vector<8x8xf32> -> vector<8x8xf32>
    %cst_114 = arith.constant dense<0.000000e+00> : vector<8x8xf32>
    %162 = tpu.matmul %160, %145, %cst_114 {dimension_numbers = #tpu.dot_dimension_numbers<[1], [0], [0], [1], [0, 0, 1, 1], [], []>} : vector<8x4xf32>, vector<4x8xf32>, vector<8x8xf32> -> vector<8x8xf32>
    %163 = arith.addf %161, %162 : vector<8x8xf32>
    %c3_115 = arith.constant 3 : index
    %c0_116 = arith.constant 0 : index
    %c0_117 = arith.constant 0 : index
    %164 = vector.load %arg2[%c3_115, %c0_116, %c0_117] : memref<5x8x4xf32, #tpu.memory_space<vmem>>, vector<1x8x4xf32>
    %165 = vector.shape_cast %164 : vector<1x8x4xf32> to vector<8x4xf32>
    %cst_118 = arith.constant dense<0.000000e+00> : vector<8x8xf32>
    %166 = tpu.matmul %163, %144, %cst_118 {dimension_numbers = #tpu.dot_dimension_numbers<[1], [0], [0], [1], [0, 0, 1, 1], [], []>} : vector<8x8xf32>, vector<8x8xf32>, vector<8x8xf32> -> vector<8x8xf32>
    %cst_119 = arith.constant dense<0.000000e+00> : vector<8x8xf32>
    %167 = tpu.matmul %165, %145, %cst_119 {dimension_numbers = #tpu.dot_dimension_numbers<[1], [0], [0], [1], [0, 0, 1, 1], [], []>} : vector<8x4xf32>, vector<4x8xf32>, vector<8x8xf32> -> vector<8x8xf32>
    %168 = arith.addf %166, %167 : vector<8x8xf32>
    %c4_120 = arith.constant 4 : index
    %c0_121 = arith.constant 0 : index
    %c0_122 = arith.constant 0 : index
    %169 = vector.load %arg2[%c4_120, %c0_121, %c0_122] : memref<5x8x4xf32, #tpu.memory_space<vmem>>, vector<1x8x4xf32>
    %170 = vector.shape_cast %169 : vector<1x8x4xf32> to vector<8x4xf32>
    %cst_123 = arith.constant dense<0.000000e+00> : vector<8x8xf32>
    %171 = tpu.matmul %168, %144, %cst_123 {dimension_numbers = #tpu.dot_dimension_numbers<[1], [0], [0], [1], [0, 0, 1, 1], [], []>} : vector<8x8xf32>, vector<8x8xf32>, vector<8x8xf32> -> vector<8x8xf32>
    %cst_124 = arith.constant dense<0.000000e+00> : vector<8x8xf32>
    %172 = tpu.matmul %170, %145, %cst_124 {dimension_numbers = #tpu.dot_dimension_numbers<[1], [0], [0], [1], [0, 0, 1, 1], [], []>} : vector<8x4xf32>, vector<4x8xf32>, vector<8x8xf32> -> vector<8x8xf32>
    %173 = arith.addf %171, %172 : vector<8x8xf32>
    %174 = tpu.concatenate %148, %153, %158, %163, %168, %173 in 0 : vector<8x8xf32>, vector<8x8xf32>, vector<8x8xf32>, vector<8x8xf32>, vector<8x8xf32>, vector<8x8xf32> -> vector<48x8xf32>
    %175 = vector.extract_strided_slice %174 {offsets = [0, 0], sizes = [48, 4], strides = [1, 1]} : vector<48x8xf32> to vector<48x4xf32>
    %c0_125 = arith.constant 0 : index
    %c0_126 = arith.constant 0 : index
    %176 = vector.load %arg7[%c0_125, %c0_126] : memref<8x32xf32, #tpu.memory_space<vmem>>, vector<8x32xf32>
    %cst_127 = arith.constant dense<0.000000e+00> : vector<48x32xf32>
    %177 = tpu.matmul %143, %176, %cst_127 {dimension_numbers = #tpu.dot_dimension_numbers<[1], [0], [0], [1], [0, 0, 1, 1], [], []>} : vector<48x8xf32>, vector<8x32xf32>, vector<48x32xf32> -> vector<48x32xf32>
    %c0_128 = arith.constant 0 : index
    %c0_129 = arith.constant 0 : index
    %178 = vector.load %arg8[%c0_128, %c0_129] : memref<1x32xf32, #tpu.memory_space<vmem>>, vector<1x32xf32>
    %179 = vector.broadcast %178 : vector<1x32xf32> to vector<48x32xf32>
    %180 = arith.addf %177, %179 : vector<48x32xf32>
    %cst_130 = arith.constant 0.000000e+00 : f32
    %181 = vector.broadcast %cst_130 : f32 to vector<48x32xf32>
    %182 = arith.maximumf %180, %181 : vector<48x32xf32>
    %c0_131 = arith.constant 0 : index
    %c0_132 = arith.constant 0 : index
    %183 = vector.load %arg9[%c0_131, %c0_132] : memref<32x8xf32, #tpu.memory_space<vmem>>, vector<32x8xf32>
    %cst_133 = arith.constant dense<0.000000e+00> : vector<48x8xf32>
    %184 = tpu.matmul %182, %183, %cst_133 {dimension_numbers = #tpu.dot_dimension_numbers<[1], [0], [0], [1], [0, 0, 1, 1], [], []>} : vector<48x32xf32>, vector<32x8xf32>, vector<48x8xf32> -> vector<48x8xf32>
    %c0_134 = arith.constant 0 : index
    %c0_135 = arith.constant 0 : index
    %185 = vector.load %arg10[%c0_134, %c0_135] : memref<1x8xf32, #tpu.memory_space<vmem>>, vector<1x8xf32>
    %186 = vector.broadcast %185 : vector<1x8xf32> to vector<48x8xf32>
    %187 = arith.addf %184, %186 : vector<48x8xf32>
    %188 = vector.extract_strided_slice %187 {offsets = [0, 0], sizes = [48, 4], strides = [1, 1]} : vector<48x8xf32> to vector<48x4xf32>
    %189 = arith.subf %175, %188 : vector<48x4xf32>
    %190 = arith.mulf %189, %189 : vector<48x4xf32>
    %191 = vector.shape_cast %190 : vector<48x4xf32> to vector<1x48x4xf32>
    %cst_136 = arith.constant dense<0.000000e+00> : vector<1xf32>
    %192 = vector.multi_reduction <add>, %191, %cst_136 [1, 2] : vector<1x48x4xf32> to vector<1xf32>
    %193 = vector.shape_cast %192 : vector<1xf32> to vector<1x1x1xf32>
    %194 = vector.extract %193[0, 0, 0] : f32 from vector<1x1x1xf32>
    %cst_137 = arith.constant 1.920000e+02 : f32
    %195 = arith.divf %194, %cst_137 : f32
    %c0_138 = arith.constant 0 : index
    %c0_139 = arith.constant 0 : index
    %196 = vector.load %arg11[%c0_138, %c0_139] : memref<4x32xf32, #tpu.memory_space<vmem>>, vector<4x32xf32>
    %cst_140 = arith.constant dense<0.000000e+00> : vector<48x32xf32>
    %197 = tpu.matmul %175, %196, %cst_140 {dimension_numbers = #tpu.dot_dimension_numbers<[1], [0], [0], [1], [0, 0, 1, 1], [], []>} : vector<48x4xf32>, vector<4x32xf32>, vector<48x32xf32> -> vector<48x32xf32>
    %c0_141 = arith.constant 0 : index
    %c0_142 = arith.constant 0 : index
    %198 = vector.load %arg12[%c0_141, %c0_142] : memref<1x32xf32, #tpu.memory_space<vmem>>, vector<1x32xf32>
    %199 = vector.broadcast %198 : vector<1x32xf32> to vector<48x32xf32>
    %200 = arith.addf %197, %199 : vector<48x32xf32>
    %cst_143 = arith.constant 0.000000e+00 : f32
    %201 = vector.broadcast %cst_143 : f32 to vector<48x32xf32>
    %202 = arith.maximumf %200, %201 : vector<48x32xf32>
    %c0_144 = arith.constant 0 : index
    %c0_145 = arith.constant 0 : index
    %203 = vector.load %arg13[%c0_144, %c0_145] : memref<32x8xf32, #tpu.memory_space<vmem>>, vector<32x8xf32>
    %cst_146 = arith.constant dense<0.000000e+00> : vector<48x8xf32>
    %204 = tpu.matmul %202, %203, %cst_146 {dimension_numbers = #tpu.dot_dimension_numbers<[1], [0], [0], [1], [0, 0, 1, 1], [], []>} : vector<48x32xf32>, vector<32x8xf32>, vector<48x8xf32> -> vector<48x8xf32>
    %c0_147 = arith.constant 0 : index
    %c0_148 = arith.constant 0 : index
    %205 = vector.load %arg14[%c0_147, %c0_148] : memref<1x8xf32, #tpu.memory_space<vmem>>, vector<1x8xf32>
    %206 = vector.broadcast %205 : vector<1x8xf32> to vector<48x8xf32>
    %207 = arith.addf %204, %206 : vector<48x8xf32>
    %208 = arith.subf %207, %143 : vector<48x8xf32>
    %209 = arith.mulf %208, %208 : vector<48x8xf32>
    %210 = vector.shape_cast %209 : vector<48x8xf32> to vector<1x48x8xf32>
    %cst_149 = arith.constant dense<0.000000e+00> : vector<1xf32>
    %211 = vector.multi_reduction <add>, %210, %cst_149 [1, 2] : vector<1x48x8xf32> to vector<1xf32>
    %212 = vector.shape_cast %211 : vector<1xf32> to vector<1x1x1xf32>
    %213 = vector.extract %212[0, 0, 0] : f32 from vector<1x1x1xf32>
    %cst_150 = arith.constant 3.840000e+02 : f32
    %214 = arith.divf %213, %cst_150 : f32
    %215 = arith.addf %214, %195 : f32
    %216 = vector.extract_strided_slice %15 {offsets = [0, 0], sizes = [8, 4], strides = [1, 1]} : vector<16x4xf32> to vector<8x4xf32>
    %217 = vector.extract_strided_slice %35 {offsets = [0, 0], sizes = [8, 4], strides = [1, 1]} : vector<16x4xf32> to vector<8x4xf32>
    %218 = tpu.concatenate %216, %217 in 1 : vector<8x4xf32>, vector<8x4xf32> -> vector<8x8xf32>
    %cst_151 = arith.constant dense<0.000000e+00> : vector<8x8xf32>
    %219 = tpu.matmul %218, %144, %cst_151 {dimension_numbers = #tpu.dot_dimension_numbers<[1], [0], [0], [1], [0, 0, 1, 1], [], []>} : vector<8x8xf32>, vector<8x8xf32>, vector<8x8xf32> -> vector<8x8xf32>
    %cst_152 = arith.constant dense<0.000000e+00> : vector<8x8xf32>
    %220 = tpu.matmul %219, %144, %cst_152 {dimension_numbers = #tpu.dot_dimension_numbers<[1], [0], [0], [1], [0, 0, 1, 1], [], []>} : vector<8x8xf32>, vector<8x8xf32>, vector<8x8xf32> -> vector<8x8xf32>
    %cst_153 = arith.constant dense<0.000000e+00> : vector<8x8xf32>
    %221 = tpu.matmul %220, %144, %cst_153 {dimension_numbers = #tpu.dot_dimension_numbers<[1], [0], [0], [1], [0, 0, 1, 1], [], []>} : vector<8x8xf32>, vector<8x8xf32>, vector<8x8xf32> -> vector<8x8xf32>
    %cst_154 = arith.constant dense<0.000000e+00> : vector<8x8xf32>
    %222 = tpu.matmul %221, %144, %cst_154 {dimension_numbers = #tpu.dot_dimension_numbers<[1], [0], [0], [1], [0, 0, 1, 1], [], []>} : vector<8x8xf32>, vector<8x8xf32>, vector<8x8xf32> -> vector<8x8xf32>
    %cst_155 = arith.constant dense<0.000000e+00> : vector<8x8xf32>
    %223 = tpu.matmul %222, %144, %cst_155 {dimension_numbers = #tpu.dot_dimension_numbers<[1], [0], [0], [1], [0, 0, 1, 1], [], []>} : vector<8x8xf32>, vector<8x8xf32>, vector<8x8xf32> -> vector<8x8xf32>
    %224 = tpu.concatenate %218, %219, %220, %221, %222, %223 in 0 : vector<8x8xf32>, vector<8x8xf32>, vector<8x8xf32>, vector<8x8xf32>, vector<8x8xf32>, vector<8x8xf32> -> vector<48x8xf32>
    %225 = vector.extract_strided_slice %224 {offsets = [0, 4], sizes = [48, 4], strides = [1, 1]} : vector<48x8xf32> to vector<48x4xf32>
    %c0_156 = arith.constant 0 : index
    %c0_157 = arith.constant 0 : index
    %226 = vector.load %arg19[%c0_156, %c0_157] : memref<4x32xf32, #tpu.memory_space<vmem>>, vector<4x32xf32>
    %cst_158 = arith.constant dense<0.000000e+00> : vector<48x32xf32>
    %227 = tpu.matmul %225, %226, %cst_158 {dimension_numbers = #tpu.dot_dimension_numbers<[1], [0], [0], [1], [0, 0, 1, 1], [], []>} : vector<48x4xf32>, vector<4x32xf32>, vector<48x32xf32> -> vector<48x32xf32>
    %c0_159 = arith.constant 0 : index
    %c0_160 = arith.constant 0 : index
    %228 = vector.load %arg20[%c0_159, %c0_160] : memref<1x32xf32, #tpu.memory_space<vmem>>, vector<1x32xf32>
    %229 = vector.broadcast %228 : vector<1x32xf32> to vector<48x32xf32>
    %230 = arith.addf %227, %229 : vector<48x32xf32>
    %cst_161 = arith.constant 0.000000e+00 : f32
    %231 = vector.broadcast %cst_161 : f32 to vector<48x32xf32>
    %232 = arith.maximumf %230, %231 : vector<48x32xf32>
    %c0_162 = arith.constant 0 : index
    %c0_163 = arith.constant 0 : index
    %233 = vector.load %arg21[%c0_162, %c0_163] : memref<32x8xf32, #tpu.memory_space<vmem>>, vector<32x8xf32>
    %cst_164 = arith.constant dense<0.000000e+00> : vector<48x8xf32>
    %234 = tpu.matmul %232, %233, %cst_164 {dimension_numbers = #tpu.dot_dimension_numbers<[1], [0], [0], [1], [0, 0, 1, 1], [], []>} : vector<48x32xf32>, vector<32x8xf32>, vector<48x8xf32> -> vector<48x8xf32>
    %c0_165 = arith.constant 0 : index
    %c0_166 = arith.constant 0 : index
    %235 = vector.load %arg22[%c0_165, %c0_166] : memref<1x8xf32, #tpu.memory_space<vmem>>, vector<1x8xf32>
    %236 = vector.broadcast %235 : vector<1x8xf32> to vector<48x8xf32>
    %237 = arith.addf %234, %236 : vector<48x8xf32>
    %238 = arith.subf %207, %237 : vector<48x8xf32>
    %239 = arith.mulf %238, %238 : vector<48x8xf32>
    %240 = vector.shape_cast %239 : vector<48x8xf32> to vector<1x48x8xf32>
    %cst_167 = arith.constant dense<0.000000e+00> : vector<1xf32>
    %241 = vector.multi_reduction <add>, %240, %cst_167 [1, 2] : vector<1x48x8xf32> to vector<1xf32>
    %242 = vector.shape_cast %241 : vector<1xf32> to vector<1x1x1xf32>
    %243 = vector.extract %242[0, 0, 0] : f32 from vector<1x1x1xf32>
    %cst_168 = arith.constant 3.840000e+02 : f32
    %244 = arith.divf %243, %cst_168 : f32
    %245 = vector.extract_strided_slice %237 {offsets = [0, 0], sizes = [48, 2], strides = [1, 1]} : vector<48x8xf32> to vector<48x2xf32>
    %246 = arith.mulf %245, %245 : vector<48x2xf32>
    %cst_169 = arith.constant dense<0.000000e+00> : vector<48xf32>
    %247 = vector.multi_reduction <add>, %246, %cst_169 [1] : vector<48x2xf32> to vector<48xf32>
    %248 = vector.shape_cast %247 : vector<48xf32> to vector<48x1xf32>
    %249 = math.sqrt %248 : vector<48x1xf32>
    %cst_170 = arith.constant 1.000000e+01 : f32
    %250 = vector.broadcast %cst_170 : f32 to vector<48x1xf32>
    %251 = arith.subf %250, %249 : vector<48x1xf32>
    %cst_171 = arith.constant 0.000000e+00 : f32
    %252 = vector.broadcast %cst_171 : f32 to vector<48x1xf32>
    %253 = arith.maximumf %251, %252 : vector<48x1xf32>
    %cst_172 = arith.constant dense<0.000000e+00> : vector<8x8xf32>
    %254 = tpu.matmul %0, %116, %cst_172 {dimension_numbers = #tpu.dot_dimension_numbers<[1], [0], [0], [1], [0, 0, 1, 1], [], []>} : vector<8x8xf32>, vector<8x8xf32>, vector<8x8xf32> -> vector<8x8xf32>
    %cst_173 = arith.constant dense<0.000000e+00> : vector<8x8xf32>
    %255 = tpu.matmul %254, %116, %cst_173 {dimension_numbers = #tpu.dot_dimension_numbers<[1], [0], [0], [1], [0, 0, 1, 1], [], []>} : vector<8x8xf32>, vector<8x8xf32>, vector<8x8xf32> -> vector<8x8xf32>
    %cst_174 = arith.constant dense<0.000000e+00> : vector<8x8xf32>
    %256 = tpu.matmul %255, %116, %cst_174 {dimension_numbers = #tpu.dot_dimension_numbers<[1], [0], [0], [1], [0, 0, 1, 1], [], []>} : vector<8x8xf32>, vector<8x8xf32>, vector<8x8xf32> -> vector<8x8xf32>
    %cst_175 = arith.constant dense<0.000000e+00> : vector<8x8xf32>
    %257 = tpu.matmul %256, %116, %cst_175 {dimension_numbers = #tpu.dot_dimension_numbers<[1], [0], [0], [1], [0, 0, 1, 1], [], []>} : vector<8x8xf32>, vector<8x8xf32>, vector<8x8xf32> -> vector<8x8xf32>
    %cst_176 = arith.constant dense<0.000000e+00> : vector<8x8xf32>
    %258 = tpu.matmul %257, %116, %cst_176 {dimension_numbers = #tpu.dot_dimension_numbers<[1], [0], [0], [1], [0, 0, 1, 1], [], []>} : vector<8x8xf32>, vector<8x8xf32>, vector<8x8xf32> -> vector<8x8xf32>
    %259 = tpu.concatenate %0, %254, %255, %256, %257, %258 in 0 : vector<8x8xf32>, vector<8x8xf32>, vector<8x8xf32>, vector<8x8xf32>, vector<8x8xf32>, vector<8x8xf32> -> vector<48x8xf32>
    %260 = vector.extract_strided_slice %259 {offsets = [0, 0], sizes = [48, 2], strides = [1, 1]} : vector<48x8xf32> to vector<48x2xf32>
    %261 = arith.mulf %260, %260 : vector<48x2xf32>
    %cst_177 = arith.constant dense<0.000000e+00> : vector<48xf32>
    %262 = vector.multi_reduction <add>, %261, %cst_177 [1] : vector<48x2xf32> to vector<48xf32>
    %263 = vector.shape_cast %262 : vector<48xf32> to vector<48x1xf32>
    %264 = math.sqrt %263 : vector<48x1xf32>
    %cst_178 = arith.constant 1.000000e+01 : f32
    %265 = vector.broadcast %cst_178 : f32 to vector<48x1xf32>
    %266 = arith.subf %265, %264 : vector<48x1xf32>
    %cst_179 = arith.constant 0.000000e+00 : f32
    %267 = vector.broadcast %cst_179 : f32 to vector<48x1xf32>
    %268 = arith.maximumf %266, %267 : vector<48x1xf32>
    %269 = vector.shape_cast %253 : vector<48x1xf32> to vector<1x48x1xf32>
    %cst_180 = arith.constant dense<0.000000e+00> : vector<1xf32>
    %270 = vector.multi_reduction <add>, %269, %cst_180 [1, 2] : vector<1x48x1xf32> to vector<1xf32>
    %271 = vector.shape_cast %270 : vector<1xf32> to vector<1x1x1xf32>
    %272 = vector.extract %271[0, 0, 0] : f32 from vector<1x1x1xf32>
    %cst_181 = arith.constant 4.800000e+01 : f32
    %273 = arith.divf %272, %cst_181 : f32
    %274 = vector.shape_cast %268 : vector<48x1xf32> to vector<1x48x1xf32>
    %cst_182 = arith.constant dense<0.000000e+00> : vector<1xf32>
    %275 = vector.multi_reduction <add>, %274, %cst_182 [1, 2] : vector<1x48x1xf32> to vector<1xf32>
    %276 = vector.shape_cast %275 : vector<1xf32> to vector<1x1x1xf32>
    %277 = vector.extract %276[0, 0, 0] : f32 from vector<1x1x1xf32>
    %cst_183 = arith.constant 4.800000e+01 : f32
    %278 = arith.divf %277, %cst_183 : f32
    %279 = arith.addf %273, %278 : f32
    %c0_184 = arith.constant 0 : index
    %c0_185 = arith.constant 0 : index
    %280 = memref.load %arg27[%c0_184, %c0_185] : memref<1x8xf32, #tpu.memory_space<smem>>
    memref.store %86, %arg27[%c0_184, %c0_185] : memref<1x8xf32, #tpu.memory_space<smem>>
    %c0_186 = arith.constant 0 : index
    %c1_187 = arith.constant 1 : index
    %281 = memref.load %arg27[%c0_186, %c1_187] : memref<1x8xf32, #tpu.memory_space<smem>>
    memref.store %106, %arg27[%c0_186, %c1_187] : memref<1x8xf32, #tpu.memory_space<smem>>
    %c0_188 = arith.constant 0 : index
    %c2_189 = arith.constant 2 : index
    %282 = memref.load %arg27[%c0_188, %c2_189] : memref<1x8xf32, #tpu.memory_space<smem>>
    memref.store %215, %arg27[%c0_188, %c2_189] : memref<1x8xf32, #tpu.memory_space<smem>>
    %c0_190 = arith.constant 0 : index
    %c3_191 = arith.constant 3 : index
    %283 = memref.load %arg27[%c0_190, %c3_191] : memref<1x8xf32, #tpu.memory_space<smem>>
    memref.store %279, %arg27[%c0_190, %c3_191] : memref<1x8xf32, #tpu.memory_space<smem>>
    %c0_192 = arith.constant 0 : index
    %c4_193 = arith.constant 4 : index
    %284 = memref.load %arg27[%c0_192, %c4_193] : memref<1x8xf32, #tpu.memory_space<smem>>
    memref.store %115, %arg27[%c0_192, %c4_193] : memref<1x8xf32, #tpu.memory_space<smem>>
    %c0_194 = arith.constant 0 : index
    %c5 = arith.constant 5 : index
    %285 = memref.load %arg27[%c0_194, %c5] : memref<1x8xf32, #tpu.memory_space<smem>>
    memref.store %244, %arg27[%c0_194, %c5] : memref<1x8xf32, #tpu.memory_space<smem>>
    %cst_195 = arith.constant 0.000000e+00 : f32
    %c0_196 = arith.constant 0 : index
    %c6 = arith.constant 6 : index
    %286 = memref.load %arg27[%c0_196, %c6] : memref<1x8xf32, #tpu.memory_space<smem>>
    memref.store %cst_195, %arg27[%c0_196, %c6] : memref<1x8xf32, #tpu.memory_space<smem>>
    %cst_197 = arith.constant 0.000000e+00 : f32
    %c0_198 = arith.constant 0 : index
    %c7 = arith.constant 7 : index
    %287 = memref.load %arg27[%c0_198, %c7] : memref<1x8xf32, #tpu.memory_space<smem>>
    memref.store %cst_197, %arg27[%c0_198, %c7] : memref<1x8xf32, #tpu.memory_space<smem>>
    return
  }
}

</mosaic_0001>

<bundles_post_ra>
// kernel: traj_opt_forward.1
= control target key start
LH: loop header
LB: loop body
LE: loop exit
PB: predicated region body
PF: predicated region fallthrough
CT: control target
= control target key end

     0   :  { %s5975_s0 = inlined_call_operand.vmem [shape: f32[8,8], index: 0, kind: input, shape index: {}]   ;;  %s5976_s1 = inlined_call_operand.vmem [shape: f32[8,8], index: 1, kind: input, shape index: {}]   ;;  %s5977_s2 = inlined_call_operand.vmem [shape: f32[5,8,4], index: 2, kind: input, shape index: {}]   ;;  %s5978_s3 = inlined_call_operand.vmem [shape: f32[16,4], index: 3, kind: input, shape index: {}]   ;;  %s5979_s4 = inlined_call_operand.vmem [shape: f32[16,4], index: 4, kind: input, shape index: {}]   ;;  %s5980_s5 = inlined_call_operand.vmem [shape: f32[32,5], index: 5, kind: input, shape index: {}]   ;;  %s5981_s6 = inlined_call_operand.vmem [shape: f32[5,8], index: 6, kind: input, shape index: {}]   ;;  %s5982_s7 = inlined_call_operand.vmem [shape: f32[8,32], index: 7, kind: input, shape index: {}]   ;;  %s5983_s8 = inlined_call_operand.vmem [shape: f32[1,32], index: 8, kind: input, shape index: {}, may-alias: {8,12,16,20}]   ;;  %s5984_s9 = inlined_call_operand.vmem [shape: f32[32,8], index: 9, kind: input, shape index: {}]   ;;  %s5985_s10 = inlined_call_operand.vmem [shape: f32[1,8], index: 10, kind: input, shape index: {}, may-alias: {10,14,18,22}]   ;;  %s5986_s11 = inlined_call_operand.vmem [shape: f32[4,32], index: 11, kind: input, shape index: {}]   ;;  %s5987_s12 = inlined_call_operand.vmem [shape: f32[1,32], index: 12, kind: input, shape index: {}, may-alias: {8,12,16,20}]   ;;  %s5988_s13 = inlined_call_operand.vmem [shape: f32[32,8], index: 13, kind: input, shape index: {}]   ;;  %s5989_s14 = inlined_call_operand.vmem [shape: f32[1,8], index: 14, kind: input, shape index: {}, may-alias: {10,14,18,22}]   ;;  %s5990_s15 = inlined_call_operand.vmem [shape: f32[8,32], index: 15, kind: input, shape index: {}]   ;;  %s5991_s16 = inlined_call_operand.vmem [shape: f32[1,32], index: 16, kind: input, shape index: {}, may-alias: {8,12,16,20}]   ;;  %s5992_s17 = inlined_call_operand.vmem [shape: f32[32,8], index: 17, kind: input, shape index: {}]   ;;  %s5993_s18 = inlined_call_operand.vmem [shape: f32[1,8], index: 18, kind: input, shape index: {}, may-alias: {10,14,18,22}]   ;;  %s5994_s19 = inlined_call_operand.vmem [shape: f32[4,32], index: 19, kind: input, shape index: {}]   ;;  %s5995_s20 = inlined_call_operand.vmem [shape: f32[1,32], index: 20, kind: input, shape index: {}, may-alias: {8,12,16,20}]   ;;  %s5996_s21 = inlined_call_operand.vmem [shape: f32[32,8], index: 21, kind: input, shape index: {}]   ;;  %s5997_s22 = inlined_call_operand.vmem [shape: f32[1,8], index: 22, kind: input, shape index: {}, may-alias: {10,14,18,22}]   ;;  %s5998_s23 = inlined_call_operand.vmem [shape: f32[8,8], index: 23, kind: input, shape index: {}]   ;;  %s5999_s24 = inlined_call_operand.vmem [shape: f32[4,8], index: 24, kind: input, shape index: {}]   ;;  %s6000_s25 = inlined_call_operand.vmem [shape: f32[8,8], index: 25, kind: input, shape index: {}]   ;;  %s6001_s26 = inlined_call_operand.vmem [shape: f32[4,8], index: 26, kind: input, shape index: {}]   ;;  %s6002_s27 = inlined_call_operand.vmem [shape: f32[1,8], index: 27, kind: output, shape index: {}]  }
   0x1   :  { %6009 = sst [smem:[#allocation5_spill]] %s5975_s0 }
   0x2   :  { %6010 = sst [smem:[#allocation6_spill]] %s5976_s1 }
   0x3   :  { %6011 = sst [smem:[#allocation7_spill]] %s5977_s2 }
   0x4   :  { %6012 = sst [smem:[#allocation8_spill]] %s5978_s3 }
   0x5   :  { %6013 = sst [smem:[#allocation9_spill]] %s5979_s4 }
   0x6   :  { %6014 = sst [smem:[#allocation10_spill]] %s5980_s5 }
   0x7   :  { %6015 = sst [smem:[#allocation11_spill]] %s5981_s6 }
   0x8   :  { %6016 = sst [smem:[#allocation12_spill]] %s5982_s7 }
   0x9   :  { %6017 = sst [smem:[#allocation13_spill]] %s5983_s8 }
   0xa   :  { %6018 = sst [smem:[#allocation14_spill]] %s5984_s9 }
   0xb   :  { %6019 = sst [smem:[#allocation15_spill]] %s5985_s10 }
   0xc   :  { %6020 = sst [smem:[#allocation16_spill]] %s5986_s11 }
   0xd   :  { %s6021_s8 = sld [smem:[#allocation12_spill]]  ;;  %s6022_s5 = sld [smem:[#allocation5_spill]]  ;;  %vm97_vm0 = vcmask 64512   ;;  %v302_v3 = vld [vmem:[%s5990_s15] sm:$0xff] }
   0xe   :  { %s6023_s10 = sld [smem:[#allocation6_spill]] }
   0xf   :  { %s6024_s2 = sld [smem:[#allocation14_spill]] }
  0x13   :  { %v5230_v0 = vld [vmem:[%s6021_s8] sm:$0xff] }
  0x14   :  { %v5235_v1 = vld [vmem:[%s6022_s5] sm:$0xff]  ;;  %4618 = vmatprep.subr.mxu0 %v5230_v0 }
  0x15   :  { %v5240_v2 = vld [vmem:[%s6023_s10] sm:$0xff]  ;;  %4620 = vmatprep.mubr.msk.f32.mxu0 %vm97_vm0, %v5235_v1  ;;  %v182_v5 = vld [vmem:[%s6024_s2 + $0x8] sm:$0xff]  ;;  %4619 = vmatpush3.msra.mxu0 %v5230_v0 }
  0x16   :  { %v181_v4 = vld [vmem:[%s6024_s2] sm:$0xff] }
  0x17   :  { %v5255_v6 = vpack.c.bf16 %v182_v5, %v181_v4 }
  0x18   :  { %32 = vsyncpa [#allocation3], 0  ;;  %4621 = vmatmul.mubr.msk.f32.vlgmr.msra.gmra.mrb[0].mxu0 %vm97_vm0, %v5240_v2  ;;  %4634 = vmatprep.subr.mxu0 %v302_v3  ;;  %v183_v7 = vld [vmem:[%s6024_s2 + $0x10] sm:$0xff]  ;;  %v184_v8 = vld [vmem:[%s6024_s2 + $0x18] sm:$0xff]  ;;  %s6025_s7 = sld [smem:[#allocation9_spill]]  ;;  %s5081_s15 = smov 4  }
  0x19   :  { %4635 = vmatpush3.msra.mxu0 %v302_v3  ;;  %4636 = vmatprep.mubr.msk.f32.mxu0 %vm97_vm0, %v5235_v1  ;;  %v5271_v9 = vpack.c.bf16 %v184_v8, %v183_v7  ;;  %v387_v10 = vld [vmem:[%s5992_s17] sm:$0xff]  ;;  %v388_v11 = vld [vmem:[%s5992_s17 + $0x8] sm:$0xff]  ;;  %v389_v13 = vld [vmem:[%s5992_s17 + $0x10] sm:$0xff]  ;;  %s6027_s10 = sld [smem:[#allocation13_spill]]  ;;  %vm192_vm1 = vcmask 261120   ;;  %vm522_vm2 = vcmask 1043456  }
  0x1a   :  { %4925 = vmatprep.subr.bf16.mxu1 %v5255_v6  ;;  %v4932_v12 = vpack.c.bf16 %v388_v11, %v387_v10  ;;  %v390_v14 = vld [vmem:[%s5992_s17 + $0x18] sm:$0xff]  ;;  %s6026_s17 = sld [smem:[#allocation8_spill]]  ;;  %v4359_v24 = vld [vmem:[%s5991_s16] ss:$0 sm:$0xff]  ;;  %s6028_s16 = sld [smem:[#allocation15_spill]]  ;;  %vm515_vm3 = vcmask 31744  }
  0x1b   :  { %4927 = vmatpush3.bf16.msra.mxu1 %v5255_v6  ;;  %v4936_v15 = vpack.c.bf16 %v390_v14, %v389_v13  ;;  %v4362_v37 = vld [vmem:[%s5993_s18] ss:$0 sm:$0xff]  ;;  %s5082_s4 = smov 124   ;;  %s6029_s28 = sld [smem:[#allocation16_spill]]  ;;  %v790_v8 = vld [vmem:[%s5996_s21 + $0x8] sm:$0xff]  ;;  %vm1019_vm4 = vcmask 1044480  }
  0x1c   :  { %4637 = vmatmul.mubr.msk.f32.vlgmr.msra.gmra.mrb[2].mxu0 %vm97_vm0, %v5240_v2  ;;  %4929 = vmatprep.subr.bf16.mxu1 %v5271_v9  ;;  %v5334_v50 = vld [vmem:[%s5994_s19] sm:$0xf]  ;;  %vm5084_vm5 = vmmov 0   ;;  %s6031_s6 = sld [smem:[#allocation7_spill]]  ;;  %s6032_s18 = sld [smem:[#allocation10_spill]]  ;;  %vm1006_vm6 = vcmask 39936  }
  0x1d   :  { %4933 = vmatprep.subr.bf16.mxu0 %v4932_v12  ;;  %v789_v7 = vld [vmem:[%s5996_s21] sm:$0xff]  ;;  %vm3761_vm7 = vcmask 15360  }
  0x1e   :  { %4935 = vmatpush3.bf16.msra.mxu0 %v4932_v12  ;;  %v485_v16 = vld [vmem:[%s6025_s7] sm:$0xff]  ;;  %v486_v17 = vld [vmem:[%s6025_s7 + $0x8] sm:$0xff]  ;;  %v5374_v11 = vpack.c.bf16 %v790_v8, %v789_v7 }
  0x1f   :  { %4931 = vmatpush3.bf16.msra.mxu1 %v5271_v9  ;;  %4937 = vmatprep.subr.bf16.mxu0 %v4936_v15  ;;  %v5302_v19 = vld [vmem:[%s6027_s10] ss:$0 sm:$0xff]  ;;  %s6030_s10 = sld [smem:[#allocation11_spill]] }
  0x20   :  { %489 = vrot.lane.b32.xlu0 %v485_v16, %s5081_s15  ;;  %v280_v18 = vld [vmem:[%s6026_s17] sm:$0xff]  ;;  %v281_v58 = vld [vmem:[%s6026_s17 + $0x8] sm:$0xff]  ;;  %v791_v16 = vld [vmem:[%s5996_s21 + $0x10] sm:$0xff] }
  0x21   :  { %v5316_v33 = vld [vmem:[%s6028_s16] ss:$0 sm:$0xff] }
  0x22   :  { %4939 = vmatpush3.bf16.msra.mxu0 %v4936_v15  ;;  %v5357_v3 = vld [vmem:[%s6029_s28] sm:$0xf] }
  0x23   :  { %4666 = vmatprep.subr.msk.mxu0 %vm522_vm2, %v5334_v50  ;;  %4650 = vmatprep.subr.msk.mxu1 %vm522_vm2, %v5357_v3 }
  0x24   :  { %491 = vrot.lane.b32.xlu0 %v486_v17, %s5081_s15  ;;  %v792_v17 = vld [vmem:[%s5996_s21 + $0x18] sm:$0xff] }
  0x28   :  { %284 = vrot.lane.b32.xlu0 %v280_v18, %s5081_s15  ;;  %v5389_v18 = vpack.c.bf16 %v792_v17, %v791_v16 }
  0x92   :  { %v490_v39 = vpop.permute.xlu0 %489 }
  0x96   :  { %v492_v48 = vpop.permute.xlu0 %491 }
  0x9a   :  { %v285_v51 = vpop.permute.xlu0 %284 }
  0xeb   :  { %v4622_v20 = vpop.f32.mrb[0].mxu0 }
  0xec   :  { %v176_v21 = vadd.f32 %v4622_v20, %v5302_v19  ;;  %v170_v22 = vpop.f32.mrb[1].mxu0  ;;  %v5083_v20 = vmov 0.0  }
  0xed   :  { %v171_v23 = vadd.f32 %v5302_v19, %v170_v22  ;;  %v604_v22 = vld [vmem:[%s5988_s13 + $0x8] sm:$0xff] }
  0xee   :  { %v180_v27 = vmax.f32 %v176_v21, 0.0  ;;  %v603_v21 = vld [vmem:[%s5988_s13] sm:$0xff] }
  0xef   :  { %v179_v25 = vmax.f32 %v171_v23, 0.0  ;;  %v4638_v26 = vpop.f32.mrb[2].mxu0  ;;  %v5400_v23 = vpack.c.bf16 %v604_v22, %v603_v21  ;;  %v5543_v22 = vld [vmem:[%s6031_s6 + $0x18] sm:$0xff] }
  0xf0   :  { %v382_v28 = vadd.f32 %v4638_v26, %v4359_v24  ;;  %v376_v29 = vpop.f32.mrb[3].mxu0 }
  0xf1   :  { %v377_v30 = vadd.f32 %v4359_v24, %v376_v29  ;;  %4631 = vmatprep.mubr.msk.f32.mxu1 %vm192_vm1, %v179_v25  ;;  %v606_v29 = vld [vmem:[%s5988_s13 + $0x18] sm:$0xff] }
  0xf2   :  { %4632 = vmatmul.mubr.msk.f32.vlgmr.msra.gmra.mrb[0].mxu1 %vm192_vm1, %v180_v27  ;;  %v386_v32 = vmax.f32 %v382_v28, 0.0  ;;  %v605_v28 = vld [vmem:[%s5988_s13 + $0x10] sm:$0xff] }
  0xf3   :  { %v385_v31 = vmax.f32 %v377_v30, 0.0  ;;  %4651 = vmatpush3.msk.msra.mxu1 %vm522_vm2, %v5357_v3  ;;  %v5418_v30 = vpack.c.bf16 %v606_v29, %v605_v28 }
  0xf4   :  { %4941 = vmatprep.subr.bf16.mxu1 %v5400_v23 }
  0xf5   :  { %4647 = vmatprep.mubr.msk.f32.mxu0 %vm192_vm1, %v385_v31  ;;  %v5425_v31 = vld [vmem:[%s5995_s20] ss:$0 sm:$0xff] }
  0xf6   :  { %4648 = vmatmul.mubr.msk.f32.vlgmr.msra.gmra.mrb[4].mxu0 %vm192_vm1, %v386_v32 }
  0xf7   :  { %4667 = vmatpush3.msk.msra.mxu0 %vm522_vm2, %v5334_v50 }
  0xf8   :  { %4949 = vmatprep.subr.bf16.mxu0 %v5374_v11 }
 0x1c5   :  { %v4633_v34 = vpop.f32.mrb[0].mxu1 }
 0x1c6   :  { %v265_v35 = vpop.f32.mrb[1].mxu1  ;;  %v5348_v59 = vadd.f32 %v4633_v34, %v5316_v33  ;;  %v1005_v34 = vld [vmem:[%s6030_s10] sm:$0x1f] }
 0x1c7   :  { %v5319_v36 = vadd.f32 %v5316_v33, %v265_v35 }
 0x1c8   :  { %v275_v60 = vmul.f32 0.5, %v5348_v59 }
 0x1c9   :  { %v4649_v38 = vpop.f32.mrb[4].mxu0  ;;  %v274_v40 = vmul.f32 0.5, %v5319_v36 }
 0x1ca   :  { %v5325_v41 = vadd.f32 %v4649_v38, %v4362_v37  ;;  %v470_v42 = vpop.f32.mrb[5].mxu0  ;;  %v278_v61 = vmul.f32 1.442695, %v275_v60  ;;  %v5510_v60 = vld [vmem:[%s5997_s22] ss:$0 sm:$0xff] }
 0x1cb   :  { %v5327_v43 = vadd.f32 %v4362_v37, %v470_v42  ;;  %v276_v44 = vmul.f32 1.442695, %v274_v40  ;;  %v5436_v42 = vld [vmem:[%s6001_s26] sm:$0xf] }
 0x1cc   :  { %v480_v45 = vmul.f32 0.5, %v5325_v41 }
 0x1cd   :  { %v479_v46 = vmul.f32 0.5, %v5327_v43  ;;  %5026 = vpow2.f32 %v276_v44  ;;  %v5447_v44 = vld [vmem:[%s6031_s6] sm:$0xff] }
 0x1ce   :  { %v483_v49 = vmul.f32 1.442695, %v480_v45  ;;  %v5453_v45 = vld [vmem:[%s6000_s25] sm:$0xff]  ;;  %s4344_s25 = sshll.u32 %s6002_s27, 4  ;;  %s4345_s25 = int_to_ptr.vmem [resolvable:$true] %s4344_s25 }
 0x1cf   :  { %v481_v47 = vmul.f32 1.442695, %v479_v46  ;;  %v5471_v46 = vld [vmem:[%s5987_s12] ss:$0 sm:$0xff]  ;;  %p5072_p1 = scmp.lt.s32.totalorder %s4345_s25, %s4345_s25 }
 0x1d1   :  { %5028 = vpow2.f32 %v481_v47 }
 0x1d2   :  { %5030 = vpow2.f32 %v483_v49 }
 0x1d3   :  { %5032 = vpow2.f32 %v278_v61 }
 0x1d7   :  { %v5027_v52 = vpop.eup %5026 }
 0x1d8   :  { %v290_v53 = vmul.f32 %v5027_v52, %v285_v51 }
 0x1da   :  { %294 = vrot.lane.b32.xlu0 %v290_v53, %s5082_s4 }
 0x1db   :  { %v5029_v54 = vpop.eup %5028 }
 0x1dc   :  { %v495_v55 = vmul.f32 %v5029_v54, %v490_v39  ;;  %v5031_v56 = vpop.eup %5030  ;;  %v1001_v54 = vld [vmem:[%s6032_s18] sm:$0xff] }
 0x1dd   :  { %v496_v57 = vmul.f32 %v5031_v56, %v492_v48  ;;  %v5033_v13 = vpop.eup %5032  ;;  %v1003_v56 = vld [vmem:[%s6032_s18 + $0x10] sm:$0xff] }
 0x1de   :  { %499 = vrot.lane.b32.xlu1 %v495_v55, %s5082_s4  ;;  %v1002_v55 = vld [vmem:[%s6032_s18 + $0x8] sm:$0xff] }
 0x1e2   :  { %501 = vrot.lane.b32.xlu1 %v496_v57, %s5082_s4  ;;  %v1004_v57 = vld [vmem:[%s6032_s18 + $0x18] sm:$0xff] }
 0x1e6   :  { %286 = vrot.lane.b32.xlu1 %v281_v58, %s5081_s15  ;;  %v5499_v58 = vld [vmem:[%s6031_s6 + $0x8] sm:$0xff] }
 0x24c   :  { %v295_v62 = vpop.permute.xlu0 %294 }
 0x24d   :  { %v5352_v63 = vadd.f32 %v295_v62, %v5319_v36 }
 0x24f   :  { %4652 = vmatprep.mubr.msk.f32.mxu1 %vm515_vm3, %v5352_v63 }
 0x250   :  { %v500_v4 = vpop.permute.xlu1 %499 }
 0x251   :  { %v505_v5 = vadd.f32 %v500_v4, %v5327_v43 }
 0x253   :  { %4668 = vmatprep.mubr.msk.f32.mxu0 %vm515_vm3, %v505_v5  ;;  %1874 = vrot.lane.b32.xlu0 %v505_v5, %s5081_s15 }
 0x254   :  { %v502_v10 = vpop.permute.xlu1 %501 }
 0x255   :  { %v506_v12 = vadd.f32 %v502_v10, %v5325_v41 }
 0x257   :  { %4669 = vmatmul.mubr.msk.f32.vlgmr.msra.gmra.mrb[6].mxu0 %vm515_vm3, %v506_v12  ;;  %v5519_v12 = vld [vmem:[%s6031_s6 + $0x10] sm:$0xff] }
 0x258   :  { %v287_v14 = vpop.permute.xlu1 %286  ;;  %4951 = vmatpush3.bf16.msra.mxu0 %v5374_v11 }
 0x259   :  { %v291_v15 = vmul.f32 %v5033_v13, %v287_v14  ;;  %4953 = vmatprep.subr.bf16.mxu0 %v5389_v18 }
 0x25b   :  { %296 = vrot.lane.b32.xlu1 %v291_v15, %s5082_s4 }
 0x25c   :  { %4955 = vmatpush3.bf16.msra.mxu0 %v5389_v18 }
 0x25d   :  { %4690 = vmatprep.subr.mxu0 %v5083_v20 }
 0x25f   :  { %3112 = vrot.lane.b32.xlu1 %v5327_v43, %s5081_s15 }
 0x2cd   :  { %v297_v24 = vpop.permute.xlu1 %296 }
 0x2ce   :  { %v301_v25 = vadd.f32 %v297_v24, %v5348_v59  ;;  %v5554_v24 = vld [vmem:[%s5989_s14] ss:$0 sm:$0xff] }
 0x2d0   :  { %4653 = vmatmul.mubr.msk.f32.vlgmr.msra.gmra.mrb[2].mxu1 %vm515_vm3, %v301_v25 }
 0x2d1   :  { %v3113_v26 = vpop.permute.xlu1 %3112  ;;  %4943 = vmatpush3.bf16.msra.mxu1 %v5400_v23 }
 0x2d2   :  { %v5408_v27 = vsel %vm515_vm3, %v5319_v36, %v3113_v26  ;;  %4945 = vmatprep.subr.bf16.mxu1 %v5418_v30 }
 0x2d3   :  { %3482 = vrot.lane.b32.xlu0 %v5408_v27, %s5082_s4 }
 0x2d5   :  { %4947 = vmatpush3.bf16.msra.mxu1 %v5418_v30 }
 0x2d6   :  { %4682 = vmatprep.subr.msk.mxu1 %vm1019_vm4, %v1005_v34 }
 0x32a   :  { %v4670_v32 = vpop.f32.mrb[6].mxu0 }
 0x32b   :  { %v784_v35 = vadd.f32 %v4670_v32, %v5425_v31  ;;  %v778_v37 = vpop.f32.mrb[7].mxu0 }
 0x32c   :  { %v779_v38 = vadd.f32 %v5425_v31, %v778_v37 }
 0x32d   :  { %v788_v40 = vmax.f32 %v784_v35, 0.0 }
 0x32e   :  { %v787_v39 = vmax.f32 %v779_v38, 0.0 }
 0x330   :  { %4679 = vmatprep.mubr.msk.f32.mxu0 %vm192_vm1, %v787_v39 }
 0x331   :  { %4680 = vmatmul.mubr.msk.f32.vlgmr.msra.gmra.mrb[8].mxu0 %vm192_vm1, %v788_v40 }
 0x332   :  { %4691 = vmatpush3.msk.msra.mxu0 %vm522_vm2, %v5436_v42  ;;  %4692 = vmatprep.mubr.msk.f32.mxu0 %vm5084_vm5, %v5083_v20 }
 0x333   :  { %4695 = vmatprep.subr.mxu0 %v5083_v20 }
 0x335   :  { %4693 = vmatmul.mubr.msk.f32.vlgmr.msra.gmra.mrb[10].mxu0 %vm515_vm3, %v5447_v44 }
 0x336   :  { %4696 = vmatpush3.msra.mxu0 %v5453_v45  ;;  %4697 = vmatprep.mubr.msk.f32.mxu0 %vm5084_vm5, %v5083_v20 }
 0x337   :  { %4710 = vmatprep.subr.mxu0 %v5083_v20 }
 0x33d   :  { %4698 = vmatmul.mubr.msk.f32.vlgmr.msra.gmra.mrb[10].mxu0 %vm97_vm0, %v5235_v1 }
 0x33e   :  { %4711 = vmatpush3.msk.msra.mxu0 %vm522_vm2, %v5436_v42  ;;  %4712 = vmatprep.mubr.msk.f32.mxu0 %vm5084_vm5, %v5083_v20 }
 0x33f   :  { %4715 = vmatprep.subr.mxu0 %v5083_v20 }
 0x341   :  { %4713 = vmatmul.mubr.msk.f32.vlgmr.msra.gmra.mrb[12].mxu0 %vm515_vm3, %v5519_v12 }
 0x342   :  { %4716 = vmatpush3.msra.mxu0 %v5453_v45  ;;  %4717 = vmatprep.mubr.msk.f32.mxu0 %vm5084_vm5, %v5083_v20 }
 0x343   :  { %4730 = vmatprep.subr.mxu0 %v5083_v20 }
 0x3a3   :  { %v4654_v47 = vpop.f32.mrb[2].mxu1 }
 0x3a4   :  { %v598_v48 = vadd.f32 %v4654_v47, %v5471_v46  ;;  %v592_v49 = vpop.f32.mrb[3].mxu1 }
 0x3a5   :  { %v593_v51 = vadd.f32 %v5471_v46, %v592_v49 }
 0x3a6   :  { %v602_v53 = vmax.f32 %v598_v48, 0.0 }
 0x3a7   :  { %v601_v52 = vmax.f32 %v593_v51, 0.0 }
 0x3a9   :  { %4663 = vmatprep.mubr.msk.f32.mxu1 %vm192_vm1, %v601_v52 }
 0x3aa   :  { %4664 = vmatmul.mubr.msk.f32.vlgmr.msra.gmra.mrb[4].mxu1 %vm192_vm1, %v602_v53 }
 0x3ab   :  { %4683 = vmatpush3.msk.msra.mxu1 %vm1019_vm4, %v1005_v34  ;;  %4684 = vmatprep.mubr.msk.f32.mxu1 %vm1006_vm6, %v1001_v54 }
 0x3ac   :  { %4700 = vmatprep.subr.mxu1 %v5083_v20 }
 0x3ae   :  { %4685 = vmatmul.mubr.msk.f32.vlgmr.msra.gmra.mrb[6].mxu1 %vm1006_vm6, %v1002_v55 }
 0x3af   :  { %4687 = vmatprep.mubr.msk.f32.mxu1 %vm1006_vm6, %v1003_v56  ;;  %4701 = vmatpush3.msk.msra.mxu1 %vm522_vm2, %v5436_v42 }
 0x3b0   :  { %4705 = vmatprep.subr.mxu1 %v5083_v20 }
 0x3b2   :  { %4688 = vmatmul.mubr.msk.f32.gmra.mrb[8].mxu1 %vm1006_vm6, %v1004_v57 }
 0x3b3   :  { %4702 = vmatprep.mubr.msk.f32.mxu1 %vm5084_vm5, %v5083_v20 }
 0x3b6   :  { %4703 = vmatmul.mubr.msk.f32.vlgmr.msra.gmra.mrb[10].mxu1 %vm515_vm3, %v5499_v58 }
 0x3b7   :  { %4706 = vmatpush3.msra.mxu1 %v5453_v45  ;;  %4707 = vmatprep.mubr.msk.f32.mxu1 %vm5084_vm5, %v5083_v20 }
 0x3b8   :  { %4720 = vmatprep.subr.mxu1 %v5083_v20 }
 0x404   :  { %v4681_v61 = vpop.f32.mrb[8].mxu0 }
 0x405   :  { %v878_v62 = vadd.f32 %v4681_v61, %v5510_v60  ;;  %v872_v4 = vpop.f32.mrb[9].mxu0 }
 0x406   :  { %v873_v5 = vadd.f32 %v5510_v60, %v872_v4 }
 0x407   :  { %v942_v7 = vsub.f32 %v878_v62, %v5240_v2 }
 0x408   :  { %v941_v8 = vsub.f32 %v873_v5, %v5235_v1 }
 0x409   :  { %v944_v10 = vmul.f32 %v942_v7, %v942_v7 }
 0x40a   :  { %v943_v13 = vmul.f32 %v941_v8, %v941_v8 }
 0x40b   :  { %v946_v14 = vsel %vm97_vm0, %v944_v10, 0.0  ;;  %v4399_v10 = vld [vmem:[%s6031_s6 + $0x20] sm:$0xff] }
 0x40c   :  { %v945_v15 = vsel %vm97_vm0, %v943_v13, 0.0 }
 0x40d   :  { %v5529_v16 = vadd.f32 %v946_v14, %v945_v15  ;;  %v5601_v15 = vld [vmem:[%s5998_s23] sm:$0xff] }
 0x410   :  { %v5531_v17 = vpop.f32.mrb[10].mxu0 }
 0x411   :  { %v4699_v21 = vpop.f32.mrb[11].mxu0  ;;  %4708 = vmatmul.mubr.msk.f32.vlgmr.msra.gmra.mrb[10].mxu1 %vm97_vm0, %v5531_v17 }
 0x412   :  { %4721 = vmatpush3.msk.msra.mxu1 %vm522_vm2, %v5436_v42  ;;  %4722 = vmatprep.mubr.msk.f32.mxu1 %vm5084_vm5, %v5083_v20  ;;  %v1875_v21 = vpop.permute.xlu0 %1874 }
 0x413   :  { %4725 = vmatprep.subr.mxu1 %v5083_v20 }
 0x415   :  { %4723 = vmatmul.mubr.msk.f32.vlgmr.msra.gmra.mrb[12].mxu1 %vm515_vm3, %v5543_v22 }
 0x416   :  { %4726 = vmatpush3.msra.mxu1 %v5453_v45  ;;  %4727 = vmatprep.mubr.msk.f32.mxu1 %vm5084_vm5, %v5083_v20 }
 0x417   :  { %4740 = vmatprep.subr.mxu1 %v5083_v20 }
 0x47d   :  { %v4665_v25 = vpop.f32.mrb[4].mxu1 }
 0x47e   :  { %v692_v26 = vadd.f32 %v4665_v25, %v5554_v24  ;;  %v686_v28 = vpop.f32.mrb[5].mxu1  ;;  %v5611_v25 = vsel %vm515_vm3, %v5352_v63, %v1875_v21 }
 0x47f   :  { %v687_v29 = vadd.f32 %v5554_v24, %v686_v28 }
 0x480   :  { %v882_v32 = vsub.f32 %v692_v26, %v5240_v2 }
 0x481   :  { %v881_v34 = vsub.f32 %v687_v29, %v5235_v1  ;;  %v4686_v35 = vpop.f32.mrb[6].mxu1 }
 0x482   :  { %v884_v37 = vmul.f32 %v882_v32, %v882_v32  ;;  %v1109_v38 = vmul.f32 %v4686_v35, %v4686_v35  ;;  %v1089_v39 = vpop.f32.mrb[7].mxu1 }
 0x483   :  { %v883_v40 = vmul.f32 %v881_v34, %v881_v34  ;;  %v1108_v47 = vmul.f32 %v1089_v39, %v1089_v39 }
 0x484   :  { %v1113_v48 = vsel %vm97_vm0, %v1109_v38, 0.0  ;;  %v886_v49 = vsel %vm97_vm0, %v884_v37, 0.0 }
 0x485   :  { %v1112_v51 = vsel %vm97_vm0, %v1108_v47, 0.0  ;;  %v4689_v52 = vpop.f32.mrb[8].mxu1  ;;  %v885_v53 = vsel %vm97_vm0, %v883_v40, 0.0 }
 0x486   :  { %v1114_v54 = vadd.f32 %v1113_v48, %v1112_v51  ;;  %v1111_v55 = vmul.f32 %v4689_v52, %v4689_v52  ;;  %v1099_v2 = vpop.f32.mrb[9].mxu1  ;;  %v5564_v56 = vadd.f32 %v886_v49, %v885_v53 }
 0x487   :  { %v1110_v57 = vmul.f32 %v1099_v2, %v1099_v2 }
 0x488   :  { %v1117_v62 = vsel %vm97_vm0, %v1111_v55, 0.0 }
 0x489   :  { %v1115_v61 = vsel %vm97_vm0, %v1110_v57, 0.0 }
 0x48a   :  { %v1116_v4 = vadd.f32 %v1115_v61, %v1114_v54 }
 0x48c   :  { %v5568_v5 = vadd.f32 %v1117_v62, %v1116_v4 }
 0x4e4   :  { %v5570_v7 = vpop.f32.mrb[10].mxu1 }
 0x4e5   :  { %v4709_v8 = vpop.f32.mrb[11].mxu1  ;;  %4718 = vmatmul.mubr.msk.f32.vlgmr.msra.gmra.mrb[12].mxu0 %vm97_vm0, %v5570_v7 }
 0x4e6   :  { %4731 = vmatpush3.msk.msra.mxu0 %vm522_vm2, %v5436_v42  ;;  %4732 = vmatprep.mubr.msk.f32.mxu0 %vm5084_vm5, %v5083_v20  ;;  %v1873_v42 = vld [vmem:[%s5999_s24] sm:$0xf] }
 0x4e7   :  { %4735 = vmatprep.subr.mxu0 %v5083_v20 }
 0x4e9   :  { %4733 = vmatmul.mubr.msk.f32.vlgmr.msra.gmra.mrb[14].mxu0 %vm515_vm3, %v4399_v10 }
 0x4ea   :  { %4736 = vmatpush3.msra.mxu0 %v5453_v45  ;;  %4737 = vmatprep.mubr.msk.f32.mxu0 %vm5084_vm5, %v5083_v20 }
 0x4eb   :  { %4750 = vmatprep.subr.mxu0 %v5083_v20 }
 0x5b8   :  { %v5590_v13 = vpop.f32.mrb[12].mxu0 }
 0x5b9   :  { %v4719_v14 = vpop.f32.mrb[13].mxu0  ;;  %4728 = vmatmul.mubr.msk.f32.vlgmr.msra.gmra.mrb[12].mxu1 %vm97_vm0, %v5590_v13 }
 0x5ba   :  { %4741 = vmatpush3.msk.msra.mxu1 %vm522_vm2, %v1873_v42  ;;  %4742 = vmatprep.mubr.msk.f32.mxu1 %vm5084_vm5, %v5083_v20 }
 0x5bb   :  { %4745 = vmatprep.subr.mxu1 %v5083_v20 }
 0x5bd   :  { %4743 = vmatmul.mubr.msk.f32.vlgmr.msra.gmra.mrb[14].mxu1 %vm515_vm3, %v5447_v44 }
 0x5be   :  { %4746 = vmatpush3.msra.mxu1 %v5601_v15  ;;  %4747 = vmatprep.mubr.msk.f32.mxu1 %vm5084_vm5, %v5083_v20 }
 0x5bf   :  { %4760 = vmatprep.subr.mxu1 %v5083_v20 }
 0x5c5   :  { %4748 = vmatmul.mubr.msk.f32.vlgmr.msra.gmra.mrb[14].mxu1 %vm97_vm0, %v5611_v25 }
 0x5c6   :  { %4761 = vmatpush3.msk.msra.mxu1 %vm522_vm2, %v1873_v42  ;;  %4762 = vmatprep.mubr.msk.f32.mxu1 %vm5084_vm5, %v5083_v20 }
 0x5c7   :  { %4765 = vmatprep.subr.mxu1 %v5083_v20 }
 0x5c9   :  { %4763 = vmatmul.mubr.msk.f32.vlgmr.msra.gmra.mrb[16].mxu1 %vm515_vm3, %v5519_v12 }
 0x5ca   :  { %4766 = vmatpush3.msra.mxu1 %v5601_v15  ;;  %4767 = vmatprep.mubr.msk.f32.mxu1 %vm5084_vm5, %v5083_v20 }
 0x5cb   :  { %4780 = vmatprep.subr.mxu1 %v5083_v20 }
 0x68c   :  { %v5625_v63 = vpop.f32.mrb[12].mxu1 }
 0x68d   :  { %v4729_v44 = vpop.f32.mrb[13].mxu1  ;;  %4738 = vmatmul.mubr.msk.f32.vlgmr.msra.gmra.mrb[14].mxu0 %vm97_vm0, %v5625_v63 }
 0x68e   :  { %4751 = vmatpush3.msk.msra.mxu0 %vm522_vm2, %v1873_v42  ;;  %4752 = vmatprep.mubr.msk.f32.mxu0 %vm5084_vm5, %v5083_v20 }
 0x68f   :  { %4755 = vmatprep.subr.mxu0 %v5083_v20 }
 0x691   :  { %4753 = vmatmul.mubr.msk.f32.vlgmr.msra.gmra.mrb[16].mxu0 %vm515_vm3, %v5499_v58 }
 0x692   :  { %4756 = vmatpush3.msra.mxu0 %v5601_v15  ;;  %4757 = vmatprep.mubr.msk.f32.mxu0 %vm5084_vm5, %v5083_v20 }
 0x693   :  { %4770 = vmatprep.subr.mxu0 %v5083_v20 }
 0x698   :  { %v5639_v12 = vpop.f32.mrb[14].mxu1 }
 0x699   :  { %v4749_v26 = vpop.f32.mrb[15].mxu1  ;;  %4758 = vmatmul.mubr.msk.f32.vlgmr.msra.gmra.mrb[16].mxu0 %vm97_vm0, %v5639_v12 }
 0x69a   :  { %4771 = vmatpush3.msk.msra.mxu0 %vm522_vm2, %v1873_v42  ;;  %4772 = vmatprep.mubr.msk.f32.mxu0 %vm5084_vm5, %v5083_v20 }
 0x69b   :  { %4775 = vmatprep.subr.mxu0 %v5083_v20 }
 0x69d   :  { %4773 = vmatmul.mubr.msk.f32.vlgmr.msra.gmra.mrb[18].mxu0 %vm515_vm3, %v5543_v22 }
 0x69e   :  { %4776 = vmatpush3.msra.mxu0 %v5601_v15  ;;  %4777 = vmatprep.mubr.msk.f32.mxu0 %vm5084_vm5, %v5083_v20 }
 0x69f   :  { %4790 = vmatprep.subr.mxu0 %v5230_v0 }
 0x760   :  { %v5653_v58 = vpop.f32.mrb[14].mxu0 }
 0x761   :  { %v4739_v28 = vpop.f32.mrb[15].mxu0 }
 0x76c   :  { %v5655_v29 = vpop.f32.mrb[16].mxu0 }
 0x76d   :  { %v4759_v32 = vpop.f32.mrb[17].mxu0  ;;  %4768 = vmatmul.mubr.msk.f32.vlgmr.msra.gmra.mrb[16].mxu1 %vm97_vm0, %v5655_v29 }
 0x76e   :  { %4781 = vmatpush3.msk.msra.mxu1 %vm522_vm2, %v1873_v42  ;;  %4782 = vmatprep.mubr.msk.f32.mxu1 %vm5084_vm5, %v5083_v20 }
 0x76f   :  { %4785 = vmatprep.subr.mxu1 %v5083_v20 }
 0x771   :  { %4783 = vmatmul.mubr.msk.f32.vlgmr.msra.gmra.mrb[18].mxu1 %vm515_vm3, %v4399_v10 }
 0x772   :  { %4786 = vmatpush3.msra.mxu1 %v5601_v15  ;;  %4787 = vmatprep.mubr.msk.f32.mxu1 %vm5084_vm5, %v5083_v20 }
 0x773   :  { %4957 = vmatprep.subr.bf16.mxu1 %v5255_v6 }
 0x840   :  { %v5668_v22 = vpop.f32.mrb[16].mxu1 }
 0x841   :  { %v4769_v34 = vpop.f32.mrb[17].mxu1  ;;  %4778 = vmatmul.mubr.msk.f32.vlgmr.msra.gmra.mrb[18].mxu0 %vm97_vm0, %v5668_v22 }
 0x842   :  { %4791 = vmatpush3.msra.mxu0 %v5230_v0  ;;  %4792 = vmatprep.mubr.msk.f32.mxu0 %vm97_vm0, %v5235_v1 }
 0x843   :  { %4818 = vmatprep.subr.msk.mxu0 %vm522_vm2, %v5357_v3 }
 0x845   :  { %4793 = vmatmul.mubr.msk.f32.vlgmr.msra.gmra.mrb[20].mxu0 %vm97_vm0, %v5531_v17 }
 0x846   :  { %4795 = vmatprep.mubr.msk.f32.mxu0 %vm97_vm0, %v5570_v7  ;;  %4819 = vmatpush3.msk.msra.mxu0 %vm522_vm2, %v5357_v3 }
 0x847   :  { %4846 = vmatprep.subr.mxu0 %v5083_v20 }
 0x849   :  { %4796 = vmatmul.mubr.msk.f32.gmra.mrb[22].mxu0 %vm97_vm0, %v5590_v13 }
 0x84a   :  { %4798 = vmatprep.mubr.msk.f32.mxu0 %vm97_vm0, %v5625_v63 }
 0x84d   :  { %4799 = vmatmul.mubr.msk.f32.gmra.mrb[24].mxu0 %vm97_vm0, %v5653_v58 }
 0x84e   :  { %4820 = vmatprep.mubr.msk.f32.mxu0 %vm515_vm3, %v5611_v25 }
 0x851   :  { %4821 = vmatmul.mubr.msk.f32.vlgmr.msra.gmra.mrb[26].mxu0 %vm515_vm3, %v5639_v12 }
 0x852   :  { %4823 = vmatprep.mubr.msk.f32.mxu0 %vm515_vm3, %v5655_v29  ;;  %4847 = vmatpush3.msra.mxu0 %v5601_v15 }
 0x853   :  { %4851 = vmatprep.subr.mxu0 %v5083_v20 }
 0x855   :  { %4824 = vmatmul.mubr.msk.f32.gmra.mrb[28].mxu0 %vm515_vm3, %v5668_v22 }
 0x914   :  { %v5700_v0 = vpop.f32.mrb[18].mxu0 }
 0x915   :  { %v4779_v3 = vpop.f32.mrb[19].mxu0  ;;  %4788 = vmatmul.mubr.msk.f32.vlgmr.msra.gmra.mrb[18].mxu1 %vm97_vm0, %v5700_v0  ;;  %4826 = vmatprep.mubr.msk.f32.mxu0 %vm515_vm3, %v5700_v0 }
 0x916   :  { %4959 = vmatpush3.bf16.msra.mxu1 %v5255_v6 }
 0x917   :  { %4961 = vmatprep.subr.bf16.mxu1 %v5271_v9 }
 0x918   :  { %v4794_v35 = vpop.f32.mrb[20].mxu0 }
 0x919   :  { %v2671_v37 = vadd.f32 %v4794_v35, %v5302_v19  ;;  %v2665_v38 = vpop.f32.mrb[21].mxu0 }
 0x91a   :  { %v2666_v39 = vadd.f32 %v5302_v19, %v2665_v38  ;;  %4963 = vmatpush3.bf16.msra.mxu1 %v5271_v9 }
 0x91b   :  { %4965 = vmatprep.subr.bf16.mxu1 %v5400_v23  ;;  %v2695_v48 = vmax.f32 %v2671_v37, 0.0 }
 0x91c   :  { %v2694_v40 = vmax.f32 %v2666_v39, 0.0  ;;  %v4797_v47 = vpop.f32.mrb[22].mxu0 }
 0x91d   :  { %v2681_v49 = vadd.f32 %v4797_v47, %v5302_v19  ;;  %v2675_v51 = vpop.f32.mrb[23].mxu0 }
 0x91e   :  { %v2676_v6 = vadd.f32 %v5302_v19, %v2675_v51  ;;  %4809 = vmatprep.mubr.msk.f32.mxu1 %vm192_vm1, %v2694_v40 }
 0x91f   :  { %4810 = vmatmul.mubr.msk.f32.vlgmr.msra.gmra.mrb[20].mxu1 %vm192_vm1, %v2695_v48  ;;  %v2697_v54 = vmax.f32 %v2681_v49, 0.0 }
 0x920   :  { %v2696_v52 = vmax.f32 %v2676_v6, 0.0  ;;  %v4800_v53 = vpop.f32.mrb[24].mxu0  ;;  %4967 = vmatpush3.bf16.msra.mxu1 %v5400_v23 }
 0x921   :  { %v2691_v9 = vadd.f32 %v4800_v53, %v5302_v19  ;;  %v2685_v55 = vpop.f32.mrb[25].mxu0  ;;  %4969 = vmatprep.subr.bf16.mxu1 %v5418_v30 }
 0x922   :  { %v2686_v2 = vadd.f32 %v5302_v19, %v2685_v55  ;;  %4812 = vmatprep.mubr.msk.f32.mxu1 %vm192_vm1, %v2696_v52 }
 0x923   :  { %4813 = vmatmul.mubr.msk.f32.gmra.mrb[22].mxu1 %vm192_vm1, %v2697_v54  ;;  %v2699_v62 = vmax.f32 %v2691_v9, 0.0 }
 0x924   :  { %v2698_v57 = vmax.f32 %v2686_v2, 0.0  ;;  %v4822_v61 = vpop.f32.mrb[26].mxu0  ;;  %4971 = vmatpush3.bf16.msra.mxu1 %v5418_v30 }
 0x925   :  { %v2933_v4 = vadd.f32 %v4822_v61, %v5471_v46  ;;  %v2927_v23 = vpop.f32.mrb[27].mxu0  ;;  %4856 = vmatprep.subr.mxu1 %v5083_v20 }
 0x926   :  { %v2928_v8 = vadd.f32 %v5471_v46, %v2927_v23  ;;  %4815 = vmatprep.mubr.msk.f32.mxu1 %vm192_vm1, %v2698_v57 }
 0x927   :  { %4816 = vmatmul.mubr.msk.f32.gmra.mrb[24].mxu1 %vm192_vm1, %v2699_v62  ;;  %v2957_v42 = vmax.f32 %v2933_v4, 0.0 }
 0x928   :  { %v2956_v19 = vmax.f32 %v2928_v8, 0.0  ;;  %v4825_v10 = vpop.f32.mrb[28].mxu0 }
 0x929   :  { %v2943_v14 = vadd.f32 %v4825_v10, %v5471_v46  ;;  %v2937_v21 = vpop.f32.mrb[29].mxu0 }
 0x92a   :  { %v2938_v30 = vadd.f32 %v5471_v46, %v2937_v21  ;;  %4837 = vmatprep.mubr.msk.f32.mxu1 %vm192_vm1, %v2956_v19 }
 0x92b   :  { %4838 = vmatmul.mubr.msk.f32.vlgmr.msra.gmra.mrb[26].mxu1 %vm192_vm1, %v2957_v42  ;;  %v2959_v26 = vmax.f32 %v2943_v14, 0.0 }
 0x92c   :  { %v2958_v44 = vmax.f32 %v2938_v30, 0.0  ;;  %4857 = vmatpush3.msra.mxu1 %v5601_v15 }
 0x92d   :  { %4866 = vmatprep.subr.mxu1 %v5083_v20 }
 0x92e   :  { %4840 = vmatprep.mubr.msk.f32.mxu1 %vm192_vm1, %v2958_v44 }
 0x92f   :  { %4841 = vmatmul.mubr.msk.f32.gmra.mrb[28].mxu1 %vm192_vm1, %v2959_v26 }
 0x9e8   :  { %v2592_v28 = vpop.f32.mrb[18].mxu1 }
 0x9e9   :  { %v4789_v32 = vpop.f32.mrb[19].mxu1  ;;  %4827 = vmatmul.mubr.msk.f32.gmra.mrb[30].mxu0 %vm515_vm3, %v2592_v28 }
 0x9ea   :  { %4848 = vmatprep.mubr.msk.f32.mxu0 %vm5084_vm5, %v5083_v20 }
 0x9ed   :  { %4849 = vmatmul.mubr.msk.f32.vlgmr.msra.gmra.mrb[32].mxu0 %vm97_vm0, %v5408_v27 }
 0x9ee   :  { %4852 = vmatpush3.msra.mxu0 %v5601_v15  ;;  %4853 = vmatprep.mubr.msk.f32.mxu0 %vm5084_vm5, %v5083_v20 }
 0x9ef   :  { %4861 = vmatprep.subr.mxu0 %v5083_v20 }
 0x9f2   :  { %v4811_v34 = vpop.f32.mrb[20].mxu1 }
 0x9f3   :  { %v2790_v3 = vadd.f32 %v4811_v34, %v5316_v33  ;;  %v2784_v35 = vpop.f32.mrb[21].mxu1 }
 0x9f4   :  { %v2785_v37 = vadd.f32 %v5316_v33, %v2784_v35 }
 0x9f5   :  { %v2814_v38 = vsub.f32 %v5639_v12, %v2790_v3 }
 0x9f6   :  { %v2813_v39 = vsub.f32 %v5611_v25, %v2785_v37  ;;  %v4814_v40 = vpop.f32.mrb[22].mxu1 }
 0x9f7   :  { %v2820_v47 = vmul.f32 %v2814_v38, %v2814_v38  ;;  %v2800_v27 = vadd.f32 %v4814_v40, %v5316_v33  ;;  %v2794_v48 = vpop.f32.mrb[23].mxu1 }
 0x9f8   :  { %v2819_v49 = vmul.f32 %v2813_v39, %v2813_v39  ;;  %v2795_v51 = vadd.f32 %v5316_v33, %v2794_v48 }
 0x9f9   :  { %v2826_v6 = vsel %vm515_vm3, %v2820_v47, 0.0  ;;  %v2816_v52 = vsub.f32 %v5668_v22, %v2800_v27 }
 0x9fa   :  { %v2825_v53 = vsel %vm515_vm3, %v2819_v49, 0.0  ;;  %v2815_v54 = vsub.f32 %v5655_v29, %v2795_v51  ;;  %v4817_v9 = vpop.f32.mrb[24].mxu1 }
 0x9fb   :  { %v2827_v12 = vadd.f32 %v2826_v6, %v2825_v53  ;;  %v2810_v25 = vadd.f32 %v4817_v9, %v5316_v33  ;;  %v2804_v55 = vpop.f32.mrb[25].mxu1  ;;  %v2822_v2 = vmul.f32 %v2816_v52, %v2816_v52 }
 0x9fc   :  { %v2821_v57 = vmul.f32 %v2815_v54, %v2815_v54  ;;  %v2805_v61 = vadd.f32 %v5316_v33, %v2804_v55 }
 0x9fd   :  { %v2818_v62 = vsub.f32 %v2592_v28, %v2810_v25  ;;  %v2830_v10 = vsel %vm515_vm3, %v2822_v2, 0.0 }
 0x9fe   :  { %v2828_v4 = vsel %vm515_vm3, %v2821_v57, 0.0  ;;  %v2817_v23 = vsub.f32 %v5700_v0, %v2805_v61  ;;  %v4839_v8 = vpop.f32.mrb[26].mxu1 }
 0x9ff   :  { %v2829_v22 = vadd.f32 %v2828_v4, %v2827_v12  ;;  %v5760_v19 = vadd.f32 %v4839_v8, %v5554_v24  ;;  %v3046_v29 = vpop.f32.mrb[27].mxu1  ;;  %v2824_v42 = vmul.f32 %v2818_v62, %v2818_v62 }
 0xa00   :  { %v2823_v14 = vmul.f32 %v2817_v23, %v2817_v23  ;;  %v5764_v21 = vadd.f32 %v5554_v24, %v3046_v29 }
 0xa01   :  { %v3076_v33 = vsub.f32 %v5760_v19, %v5531_v17  ;;  %v2831_v30 = vadd.f32 %v2830_v10, %v2829_v22  ;;  %v2834_v38 = vsel %vm515_vm3, %v2824_v42, 0.0 }
 0xa02   :  { %v3075_v0 = vsub.f32 %v5764_v21, %v5235_v1  ;;  %v4842_v44 = vpop.f32.mrb[28].mxu1  ;;  %v2832_v26 = vsel %vm515_vm3, %v2823_v14, 0.0 }
 0xa03   :  { %v3082_v28 = vmul.f32 %v3076_v33, %v3076_v33  ;;  %v5772_v32 = vadd.f32 %v4842_v44, %v5554_v24  ;;  %v3056_v34 = vpop.f32.mrb[29].mxu1  ;;  %v2833_v3 = vadd.f32 %v2832_v26, %v2831_v30 }
 0xa04   :  { %v3081_v35 = vmul.f32 %v3075_v0, %v3075_v0  ;;  %v5775_v37 = vadd.f32 %v5554_v24, %v3056_v34  ;;  %v3483_v0 = vpop.permute.xlu0 %3482 }
 0xa05   :  { %v3078_v17 = vsub.f32 %v5772_v32, %v5590_v13  ;;  %v5780_v39 = vadd.f32 %v2834_v38, %v2833_v3  ;;  %v3088_v1 = vsel %vm97_vm0, %v3082_v28, 0.0 }
 0xa06   :  { %v3087_v40 = vsel %vm97_vm0, %v3081_v35, 0.0  ;;  %v3077_v47 = vsub.f32 %v5775_v37, %v5570_v7 }
 0xa07   :  { %v3084_v27 = vmul.f32 %v3078_v17, %v3078_v17  ;;  %v3089_v49 = vadd.f32 %v3088_v1, %v3087_v40  ;;  %v960_v17 = vmul.f32 %v5327_v43, %v5327_v43 }
 0xa08   :  { %v3083_v48 = vmul.f32 %v3077_v47, %v3077_v47 }
 0xa09   :  { %v3092_v52 = vsel %vm97_vm0, %v3084_v27, 0.0 }
 0xa0a   :  { %v3090_v51 = vsel %vm97_vm0, %v3083_v48, 0.0 }
 0xa0b   :  { %v3091_v6 = vadd.f32 %v3090_v51, %v3089_v49 }
 0xa0d   :  { %v3093_v53 = vadd.f32 %v3092_v52, %v3091_v6 }
 0xabc   :  { %v4828_v54 = vpop.f32.mrb[30].mxu0 }
 0xabd   :  { %v2953_v13 = vadd.f32 %v4828_v54, %v5471_v46  ;;  %v2947_v9 = vpop.f32.mrb[31].mxu0  ;;  %v912_v54 = vmul.f32 1.442695, %v5319_v36 }
 0xabe   :  { %v2948_v12 = vadd.f32 %v5471_v46, %v2947_v9 }
 0xabf   :  { %v2961_v2 = vmax.f32 %v2953_v13, 0.0  ;;  %5034 = vpow2.f32 %v912_v54 }
 0xac0   :  { %v2960_v25 = vmax.f32 %v2948_v12, 0.0  ;;  %v3185_v55 = vpop.f32.mrb[32].mxu0  ;;  %v901_v12 = vmul.f32 %v5348_v59, %v5348_v59 }
 0xac1   :  { %3484 = vrot.lane.b32.xlu1 %v3185_v55, %s5082_s4  ;;  %v4850_v7 = vpop.f32.mrb[33].mxu0  ;;  %4854 = vmatmul.mubr.msk.f32.vlgmr.msra.gmra.mrb[34].mxu0 %vm97_vm0, %v3185_v55  ;;  %v898_v55 = vadd.f32 1.0, %v5319_v36 }
 0xac2   :  { %4843 = vmatprep.mubr.msk.f32.mxu1 %vm192_vm1, %v2960_v25  ;;  %4862 = vmatpush3.msra.mxu0 %v5601_v15  ;;  %v961_v7 = vmul.f32 %v5325_v41, %v5325_v41 }
 0xac3   :  { %4844 = vmatmul.mubr.msk.f32.gmra.mrb[30].mxu1 %vm192_vm1, %v2961_v2  ;;  %4863 = vmatprep.mubr.msk.f32.mxu0 %vm5084_vm5, %v5083_v20 }
 0xac4   :  { %4858 = vmatprep.mubr.msk.f32.mxu1 %vm5084_vm5, %v5083_v20  ;;  %4871 = vmatprep.subr.msk.mxu0 %vm522_vm2, %v5334_v50 }
 0xb94   :  { %v3258_v46 = vpop.f32.mrb[34].mxu0 }
 0xb95   :  { %3486 = vrot.lane.b32.xlu0 %v3258_v46, %s5082_s4  ;;  %v4855_v57 = vpop.f32.mrb[35].mxu0  ;;  %4859 = vmatmul.mubr.msk.f32.vlgmr.msra.gmra.mrb[32].mxu1 %vm97_vm0, %v3258_v46  ;;  %v5035_v46 = vpop.eup %5034 }
 0xb96   :  { %v4845_v61 = vpop.f32.mrb[30].mxu1  ;;  %4867 = vmatpush3.msra.mxu1 %v5601_v15  ;;  %4868 = vmatprep.mubr.msk.f32.mxu1 %vm5084_vm5, %v5083_v20 }
 0xb97   :  { %v5807_v62 = vadd.f32 %v4845_v61, %v5554_v24  ;;  %v3066_v4 = vpop.f32.mrb[31].mxu1  ;;  %4973 = vmatprep.subr.bf16.mxu1 %v5374_v11 }
 0xb98   :  { %v5811_v23 = vadd.f32 %v5554_v24, %v3066_v4 }
 0xb99   :  { %v3080_v8 = vsub.f32 %v5807_v62, %v5653_v58 }
 0xb9a   :  { %v3079_v22 = vsub.f32 %v5811_v23, %v5625_v63  ;;  %v3485_v63 = vpop.permute.xlu1 %3484 }
 0xb9b   :  { %v3086_v29 = vmul.f32 %v3080_v8, %v3080_v8 }
 0xb9c   :  { %v3085_v15 = vmul.f32 %v3079_v22, %v3079_v22 }
 0xb9d   :  { %v3096_v14 = vsel %vm97_vm0, %v3086_v29, 0.0 }
 0xb9e   :  { %v3094_v10 = vsel %vm97_vm0, %v3085_v15, 0.0 }
 0xb9f   :  { %v3095_v42 = vadd.f32 %v3094_v10, %v3093_v53 }
 0xba1   :  { %v5819_v33 = vadd.f32 %v3096_v14, %v3095_v42 }
 0xc07   :  { %v3487_v58 = vpop.permute.xlu0 %3486 }
 0xc68   :  { %v3331_v30 = vpop.f32.mrb[32].mxu1 }
 0xc69   :  { %3488 = vrot.lane.b32.xlu1 %v3331_v30, %s5082_s4  ;;  %v4860_v24 = vpop.f32.mrb[33].mxu1  ;;  %4864 = vmatmul.mubr.msk.f32.vlgmr.msra.gmra.mrb[36].mxu0 %vm97_vm0, %v3331_v30 }
 0xc6a   :  { %4873 = vmatprep.mubr.msk.f32.mxu0 %vm515_vm3, %v3483_v0  ;;  %4872 = vmatpush3.msk.msra.mxu0 %vm522_vm2, %v5334_v50  ;;  %v900_v50 = vmul.f32 %v5319_v36, %v5319_v36  ;;  %vm4274_vm2 = vcmask 7168  }
 0xc6b   :  { %4899 = vmatprep.subr.mxu0 %v5083_v20 }
 0xc6d   :  { %4874 = vmatmul.mubr.msk.f32.vlgmr.msra.gmra.mrb[38].mxu0 %vm515_vm3, %v3485_v63 }
 0xc6e   :  { %4876 = vmatprep.mubr.msk.f32.mxu0 %vm515_vm3, %v3487_v58  ;;  %4900 = vmatpush3.msra.mxu0 %v5453_v45 }
 0xc6f   :  { %4904 = vmatprep.subr.mxu0 %v5083_v20 }
 0xcdb   :  { %v3489_v44 = vpop.permute.xlu1 %3488 }
 0xcdc   :  { %4877 = vmatmul.mubr.msk.f32.gmra.mrb[40].mxu0 %vm515_vm3, %v3489_v44 }
 0xd3c   :  { %v3404_v26 = vpop.f32.mrb[36].mxu0 }
 0xd3d   :  { %3490 = vrot.lane.b32.xlu0 %v3404_v26, %s5082_s4  ;;  %v4865_v28 = vpop.f32.mrb[37].mxu0  ;;  %4869 = vmatmul.mubr.msk.f32.vlgmr.msra.gmra.mrb[34].mxu1 %vm97_vm0, %v3404_v26 }
 0xd3e   :  { %4975 = vmatpush3.bf16.msra.mxu1 %v5374_v11 }
 0xd3f   :  { %4977 = vmatprep.subr.bf16.mxu1 %v5389_v18 }
 0xd40   :  { %v4875_v34 = vpop.f32.mrb[38].mxu0 }
 0xd41   :  { %v3578_v3 = vadd.f32 %v4875_v34, %v5425_v31  ;;  %904 = vrot.lane.b32.xlu0 %v900_v50, %s5081_s15  ;;  %v3572_v35 = vpop.f32.mrb[39].mxu0 }
 0xd42   :  { %v3573_v38 = vadd.f32 %v5425_v31, %v3572_v35  ;;  %4979 = vmatpush3.bf16.msra.mxu1 %v5389_v18  ;;  %v5066_v18 = vld [vmem:[%s6022_s5] sm:$0xff]  ;;  %s5085_s5 = smov 0.0  }
 0xd43   :  { %4909 = vmatprep.subr.mxu1 %v5083_v20  ;;  %v3602_v1 = vmax.f32 %v3578_v3, 0.0  ;;  %v4196_v40 = vmul.f32 %v5066_v18, %v5066_v18  ;;  %4335 = sst [smem:[#allocation2 + $0x6]] %s5085_s5 }
 0xd44   :  { %v3601_v11 = vmax.f32 %v3573_v38, 0.0  ;;  %4337 = sst [smem:[#allocation2 + $0x7]] %s5085_s5  ;;  %s5067_s5 = scalar_lea.vmem %s4345_s25, 16 }
 0xd45   :  { %964 = vrot.lane.b32.xlu0 %v960_v17, %s5081_s15  ;;  %v4202_v47 = vsel %vm3761_vm7, %v4196_v40, 0.0  ;;  %p5068_p0 = scmp.ne.s32.totalorder %s4345_s25, %s5067_s5  ;;  %p5073_p2 = scmp.lt.s32.totalorder %s5067_s5, %s5067_s5 }
 0xd46   :  { %4890 = vmatprep.mubr.msk.f32.mxu1 %vm192_vm1, %v3601_v11 }
 0xd47   :  { %4891 = vmatmul.mubr.msk.f32.vlgmr.msra.gmra.mrb[36].mxu1 %vm192_vm1, %v3602_v1  ;;  %p5074_p3 = por %p5073_p2, %p5072_p1 }
 0xd48   :  { %4910 = vmatpush3.msra.mxu1 %v5453_v45 }
 0xd49   :  { %4919 = vmatprep.subr.mxu1 %v5083_v20  ;;  %p5075_p4 = pnand %p5074_p3, %p5068_p0 }
 0xd64   :  { %4203 = vadd.xlane.f32.xlu0 %v4202_v47 }
 0xdaf   :  { %v4878_v27 = vpop.f32.mrb[40].mxu0  ;;  %v3491_v48 = vpop.permute.xlu0 %3490 }
 0xdb0   :  { %v3588_v49 = vadd.f32 %v4878_v27, %v5425_v31  ;;  %v3582_v51 = vpop.f32.mrb[41].mxu0  ;;  %4879 = vmatprep.mubr.msk.f32.mxu0 %vm515_vm3, %v3491_v48 }
 0xdb1   :  { %v3583_v6 = vadd.f32 %v5425_v31, %v3582_v51 }
 0xdb2   :  { %v3604_v53 = vmax.f32 %v3588_v49, 0.0 }
 0xdb3   :  { %v3603_v52 = vmax.f32 %v3583_v6, 0.0  ;;  %v905_v25 = vpop.permute.xlu0 %904 }
 0xdb4   :  { %v910_v2 = vsub.f32 %v898_v55, %v905_v25 }
 0xdb5   :  { %4893 = vmatprep.mubr.msk.f32.mxu1 %vm192_vm1, %v3603_v52 }
 0xdb6   :  { %4894 = vmatmul.mubr.msk.f32.gmra.mrb[38].mxu1 %vm192_vm1, %v3604_v53  ;;  %v916_v61 = vsub.f32 %v910_v2, %v5035_v46 }
 0xe10   :  { %v3477_v13 = vpop.f32.mrb[34].mxu1 }
 0xe11   :  { %3492 = vrot.lane.b32.xlu1 %v3477_v13, %s5082_s4  ;;  %v4870_v9 = vpop.f32.mrb[35].mxu1 }
 0xe15   :  { %906 = vrot.lane.b32.xlu1 %v901_v12, %s5081_s15 }
 0xe19   :  { %966 = vrot.lane.b32.xlu1 %v961_v7, %s5081_s15 }
 0xe1a   :  { %v4892_v57 = vpop.f32.mrb[36].mxu1 }
 0xe1b   :  { %v3697_v4 = vadd.f32 %v4892_v57, %v5510_v60  ;;  %v3691_v8 = vpop.f32.mrb[37].mxu1 }
 0xe1c   :  { %v3692_v22 = vadd.f32 %v5510_v60, %v3691_v8 }
 0xe1d   :  { %v3721_v29 = vsub.f32 %v5760_v19, %v3697_v4  ;;  %920 = vrot.lane.b32.xlu1 %v916_v61, %s5082_s4  ;;  %v3756_v63 = vmul.f32 %v3697_v4, %v3697_v4 }
 0xe1e   :  { %v3720_v36 = vsub.f32 %v5764_v21, %v3692_v22  ;;  %v3755_v15 = vmul.f32 %v3692_v22, %v3692_v22 }
 0xe1f   :  { %v3727_v10 = vmul.f32 %v3721_v29, %v3721_v29  ;;  %v3765_v58 = vsel %vm3761_vm7, %v3756_v63, 0.0  ;;  %v959_v63 = vadd.f32 1.0, %v5325_v41 }
 0xe20   :  { %v3726_v42 = vmul.f32 %v3720_v36, %v3720_v36  ;;  %v3762_v14 = vsel %vm3761_vm7, %v3755_v15, 0.0 }
 0xe21   :  { %v3733_v30 = vsel %vm97_vm0, %v3727_v10, 0.0  ;;  %3763 = vadd.xlane.f32.xlu0 %v3762_v14  ;;  %v972_v10 = vmul.f32 1.442695, %v5327_v43  ;;  %v965_v14 = vpop.permute.xlu0 %964 }
 0xe22   :  { %v3732_v0 = vsel %vm97_vm0, %v3726_v42, 0.0 }
 0xe23   :  { %v3734_v24 = vadd.f32 %v3733_v30, %v3732_v0  ;;  %5036 = vpow2.f32 %v972_v10  ;;  %v958_v30 = vadd.f32 1.0, %v5327_v43 }
 0xe25   :  { %v970_v0 = vsub.f32 %v958_v30, %v965_v14 }
 0xe41   :  { %3766 = vadd.xlane.f32.xlu1 %v3765_v58  ;;  %v5037_v58 = vpop.eup %5036 }
 0xe83   :  { %v3493_v19 = vpop.permute.xlu1 %3492 }
 0xe84   :  { %4880 = vmatmul.mubr.msk.f32.gmra.mrb[42].mxu0 %vm515_vm3, %v3493_v19  ;;  %v976_v19 = vsub.f32 %v970_v0, %v5037_v58 }
 0xe85   :  { %4901 = vmatprep.mubr.msk.f32.mxu0 %vm5084_vm5, %v5083_v20 }
 0xe87   :  { %v5921_v42 = vpop.permute.xlu1 %906 }
 0xe88   :  { %4902 = vmatmul.mubr.msk.f32.vlgmr.msra.gmra.mrb[44].mxu0 %vm97_vm0, %v5066_v18 }
 0xe89   :  { %v4895_v21 = vpop.f32.mrb[38].mxu1  ;;  %4905 = vmatpush3.msra.mxu0 %v5453_v45  ;;  %4906 = vmatprep.mubr.msk.f32.mxu0 %vm5084_vm5, %v5083_v20 }
 0xe8a   :  { %v3707_v44 = vadd.f32 %v4895_v21, %v5510_v60  ;;  %v3701_v26 = vpop.f32.mrb[39].mxu1  ;;  %4914 = vmatprep.subr.mxu0 %v5083_v20 }
 0xe8b   :  { %v3702_v28 = vadd.f32 %v5510_v60, %v3701_v26 }
 0xe8c   :  { %v3723_v50 = vsub.f32 %v5772_v32, %v3707_v44  ;;  %v3758_v34 = vmul.f32 %v3707_v44, %v3707_v44 }
 0xe8d   :  { %v3722_v3 = vsub.f32 %v5775_v37, %v3702_v28  ;;  %v3757_v38 = vmul.f32 %v3702_v28, %v3702_v28 }
 0xe8e   :  { %v3771_v35 = vsel %vm3761_vm7, %v3758_v34, 0.0  ;;  %v3729_v17 = vmul.f32 %v3723_v50, %v3723_v50  ;;  %v5929_v34 = vpop.xlane.xlu0 %4203 }
 0xe8f   :  { %v3728_v11 = vmul.f32 %v3722_v3, %v3722_v3  ;;  %3772 = vadd.xlane.f32.xlu1 %v3771_v35  ;;  %v3768_v40 = vsel %vm3761_vm7, %v3757_v38, 0.0 }
 0xe90   :  { %v3737_v47 = vsel %vm97_vm0, %v3729_v17, 0.0 }
 0xe91   :  { %v3735_v1 = vsel %vm97_vm0, %v3728_v11, 0.0 }
 0xe92   :  { %v3736_v18 = vadd.f32 %v3735_v1, %v3734_v24  ;;  %v967_v24 = vpop.permute.xlu1 %966 }
 0xe93   :  { %3769 = vadd.xlane.f32.xlu1 %v3768_v40  ;;  %v971_v21 = vsub.f32 %v959_v63, %v967_v24 }
 0xe94   :  { %v3738_v27 = vadd.f32 %v3737_v47, %v3736_v18 }
 0xe96   :  { %v5927_v28 = vpop.permute.xlu1 %920 }
 0xeae   :  { %v3764_v43 = vpop.xlane.xlu0 %3763 }
 0xeaf   :  { %vm3782_vm9 = vcmp.eq.f32.partialorder %v3764_v43, inf  ;;  %vm3784_vm12 = vcmp.eq.f32.partialorder %v3764_v43, 0.0 }
 0xece   :  { %v3767_v50 = vpop.xlane.xlu1 %3766 }
 0xecf   :  { %vm3789_vm8 = vcmp.eq.f32.partialorder %v3767_v50, inf  ;;  %vm3791_vm11 = vcmp.eq.f32.partialorder %v3767_v50, 0.0 }
 0xf1c   :  { %v3773_v3 = vpop.xlane.xlu1 %3772 }
 0xf1d   :  { %vm3803_vm14 = vcmp.eq.f32.partialorder %v3773_v3, inf  ;;  %vm3805_vm15 = vcmp.eq.f32.partialorder %v3773_v3, 0.0 }
 0xf20   :  { %v3770_v35 = vpop.xlane.xlu1 %3769 }
 0xf21   :  { %vm3796_vm10 = vcmp.eq.f32.partialorder %v3770_v35, inf  ;;  %vm3798_vm13 = vcmp.eq.f32.partialorder %v3770_v35, 0.0 }
 0xf57   :  { %v4881_v48 = vpop.f32.mrb[42].mxu0 }
 0xf58   :  { %v3598_v32 = vadd.f32 %v4881_v48, %v5425_v31  ;;  %v3592_v49 = vpop.f32.mrb[43].mxu0  ;;  %v3792_v48 = vand.u32 2147483648, %v3767_v50 }
 0xf59   :  { %v3593_v37 = vadd.f32 %v5425_v31, %v3592_v49 }
 0xf5a   :  { %v3606_v52 = vmax.f32 %v3598_v32, 0.0 }
 0xf5b   :  { %v3605_v51 = vmax.f32 %v3593_v37, 0.0  ;;  %v3900_v6 = vpop.f32.mrb[44].mxu0  ;;  %v3785_v37 = vand.u32 2147483648, %v3764_v43 }
 0xf5c   :  { %v4197_v53 = vmul.f32 %v3900_v6, %v3900_v6  ;;  %v4903_v54 = vpop.f32.mrb[45].mxu0  ;;  %4907 = vmatmul.mubr.msk.f32.vlgmr.msra.gmra.mrb[46].mxu0 %vm97_vm0, %v3900_v6 }
 0xf5d   :  { %4896 = vmatprep.mubr.msk.f32.mxu1 %vm192_vm1, %v3605_v51  ;;  %4915 = vmatpush3.msra.mxu0 %v5453_v45  ;;  %v3799_v51 = vand.u32 2147483648, %v3770_v35 }
 0xf5e   :  { %4897 = vmatmul.mubr.msk.f32.gmra.mrb[40].mxu1 %vm192_vm1, %v3606_v52  ;;  %v4205_v13 = vsel %vm3761_vm7, %v4197_v53, 0.0  ;;  %4916 = vmatprep.mubr.msk.f32.mxu0 %vm5084_vm5, %v5083_v20 }
 0xf5f   :  { %4206 = vadd.xlane.f32.xlu0 %v4205_v13  ;;  %4911 = vmatprep.mubr.msk.f32.mxu1 %vm5084_vm5, %v5083_v20 }
0x102f   :  { %v3973_v31 = vpop.f32.mrb[46].mxu0 }
0x1030   :  { %v4198_v9 = vmul.f32 %v3973_v31, %v3973_v31  ;;  %v4908_v12 = vpop.f32.mrb[47].mxu0  ;;  %4912 = vmatmul.mubr.msk.f32.vlgmr.msra.gmra.mrb[42].mxu1 %vm97_vm0, %v3973_v31 }
0x1031   :  { %v4898_v25 = vpop.f32.mrb[40].mxu1  ;;  %4920 = vmatpush3.msra.mxu1 %v5453_v45  ;;  %4921 = vmatprep.mubr.msk.f32.mxu1 %vm5084_vm5, %v5083_v20 }
0x1032   :  { %v3717_v55 = vadd.f32 %v4898_v25, %v5510_v60  ;;  %v3711_v2 = vpop.f32.mrb[41].mxu1  ;;  %v4208_v7 = vsel %vm3761_vm7, %v4198_v9, 0.0 }
0x1033   :  { %v3712_v46 = vadd.f32 %v5510_v60, %v3711_v2  ;;  %4209 = vadd.xlane.f32.xlu0 %v4208_v7 }
0x1034   :  { %v3725_v57 = vsub.f32 %v5807_v62, %v3717_v55  ;;  %v3760_v61 = vmul.f32 %v3717_v55, %v3717_v55  ;;  %v3806_v55 = vand.u32 2147483648, %v3773_v3 }
0x1035   :  { %v3724_v4 = vsub.f32 %v5811_v23, %v3712_v46  ;;  %v3759_v22 = vmul.f32 %v3712_v46, %v3712_v46  ;;  %v974_v23 = vmul.f32 1.442695, %v5325_v41 }
0x1036   :  { %v3777_v8 = vsel %vm3761_vm7, %v3760_v61, 0.0  ;;  %v3731_v45 = vmul.f32 %v3725_v57, %v3725_v57 }
0x1037   :  { %v3730_v29 = vmul.f32 %v3724_v4, %v3724_v4  ;;  %3778 = vadd.xlane.f32.xlu1 %v3777_v8  ;;  %v3774_v36 = vsel %vm3761_vm7, %v3759_v22, 0.0  ;;  %5038 = vpow2.f32 %v974_v23 }
0x1038   :  { %v3741_v60 = vsel %vm97_vm0, %v3731_v45, 0.0  ;;  %5040 = vrsqrt.f32 %v3767_v50 }
0x1039   :  { %v3739_v20 = vsel %vm97_vm0, %v3730_v29, 0.0  ;;  %5042 = vrsqrt.f32 %v3764_v43 }
0x103a   :  { %v3740_v15 = vadd.f32 %v3739_v20, %v3738_v27  ;;  %5044 = vrsqrt.f32 %v3770_v35 }
0x103b   :  { %3775 = vadd.xlane.f32.xlu1 %v3774_v36  ;;  %5046 = vrsqrt.f32 %v3773_v3 }
0x103c   :  { %v5918_v62 = vadd.f32 %v3741_v60, %v3740_v15 }
0x1041   :  { %v5039_v44 = vpop.eup %5038 }
0x1042   :  { %v977_v26 = vsub.f32 %v971_v21, %v5039_v44  ;;  %v5041_v41 = vpop.eup %5040 }
0x1043   :  { %v5043_v38 = vpop.eup %5042  ;;  %v3788_v11 = vmul.f32 %v5041_v41, %v3767_v50 }
0x1044   :  { %v5045_v17 = vpop.eup %5044  ;;  %v3781_v1 = vmul.f32 %v5043_v38, %v3764_v43 }
0x1045   :  { %v3795_v18 = vmul.f32 %v5045_v17, %v3770_v35  ;;  %v3790_v40 = vsel %vm3789_vm8, %v3767_v50, %v3788_v11  ;;  %v5047_v27 = vpop.eup %5046  ;;  %vm4224_vm8 = vcmp.eq.f32.partialorder %v5929_v34, 0.0 }
0x1046   :  { %v3783_v32 = vsel %vm3782_vm9, %v3764_v43, %v3781_v1  ;;  %v3793_v6 = vsel %vm3791_vm11, %v3792_v48, %v3790_v40  ;;  %v3802_v52 = vmul.f32 %v5047_v27, %v3773_v3 }
0x1047   :  { %v3797_v49 = vsel %vm3796_vm10, %v3770_v35, %v3795_v18  ;;  %v3786_v54 = vsel %vm3784_vm12, %v3785_v37, %v3783_v32  ;;  %v3823_v31 = vsub.f32 10.0, %v3793_v6  ;;  %v899_v6 = vadd.f32 1.0, %v5348_v59 }
0x1048   :  { %v3800_v13 = vsel %vm3798_vm13, %v3799_v51, %v3797_v49  ;;  %v3804_v9 = vsel %vm3803_vm14, %v3773_v3, %v3802_v52  ;;  %v3822_v12 = vsub.f32 10.0, %v3786_v54  ;;  %v914_v51 = vmul.f32 1.442695, %v5348_v59  ;;  %v4207_v59 = vpop.xlane.xlu0 %4206 }
0x1049   :  { %v3824_v25 = vsub.f32 10.0, %v3800_v13  ;;  %v3829_v2 = vmax.f32 %v3823_v31, 0.0  ;;  %v3807_v46 = vsel %vm3805_vm15, %v3806_v55, %v3804_v9  ;;  %v911_v52 = vsub.f32 %v899_v6, %v5921_v42 }
0x104a   :  { %v3828_v61 = vmax.f32 %v3822_v12, 0.0  ;;  %v3825_v45 = vsub.f32 10.0, %v3807_v46  ;;  %vm4231_vm10 = vcmp.eq.f32.partialorder %v4207_v59, 0.0 }
0x104b   :  { %v3830_v4 = vmax.f32 %v3824_v25, 0.0  ;;  %v4276_v29 = vsel %vm4274_vm2, %v3829_v2, 0.0 }
0x104c   :  { %980 = vrot.lane.b32.xlu1 %v976_v19, %s5082_s4  ;;  %v4275_v10 = vsel %vm4274_vm2, %v3828_v61, 0.0  ;;  %v3831_v24 = vmax.f32 %v3825_v45, 0.0 }
0x104d   :  { %v4278_v60 = vsel %vm4274_vm2, %v3830_v4, 0.0  ;;  %v4277_v14 = vadd.f32 %v4276_v29, %v4275_v10  ;;  %v4225_v4 = vand.u32 2147483648, %v5929_v34  ;;  %v4232_v29 = vand.u32 2147483648, %v4207_v59 }
0x104f   :  { %v4279_v58 = vadd.f32 %v4278_v60, %v4277_v14 }
0x1050   :  { %982 = vrot.lane.b32.xlu1 %v977_v26, %s5082_s4  ;;  %v4280_v26 = vsel %vm4274_vm2, %v3831_v24, 0.0 }
0x1051   :  { %v4281_v50 = vadd.f32 %v4280_v26, %v4279_v58  ;;  %v926_v26 = vsel %vm515_vm3, %v5927_v28, 0.0 }
0x10c0   :  { %v4210_v42 = vpop.xlane.xlu0 %4209 }
0x10c1   :  { %vm4236_vm9 = vcmp.eq.f32.partialorder %v4210_v42, inf  ;;  %vm4238_vm12 = vcmp.eq.f32.partialorder %v4210_v42, 0.0 }
0x10c4   :  { %v3779_v47 = vpop.xlane.xlu1 %3778 }
0x10c5   :  { %5048 = vrsqrt.f32 %v3779_v47  ;;  %vm3817_vm1 = vcmp.eq.f32.partialorder %v3779_v47, inf  ;;  %v3820_v8 = vand.u32 2147483648, %v3779_v47  ;;  %vm3819_vm4 = vcmp.eq.f32.partialorder %v3779_v47, 0.0 }
0x10c8   :  { %v3776_v53 = vpop.xlane.xlu1 %3775 }
0x10c9   :  { %5050 = vrsqrt.f32 %v3776_v53  ;;  %vm3810_vm5 = vcmp.eq.f32.partialorder %v3776_v53, inf  ;;  %v3813_v23 = vand.u32 2147483648, %v3776_v53  ;;  %vm3812_vm6 = vcmp.eq.f32.partialorder %v3776_v53, 0.0 }
0x10ca   :  { %5052 = vpow2.f32 %v914_v51 }
0x10cb   :  { %5054 = vrsqrt.f32 %v5929_v34 }
0x10cc   :  { %v981_v13 = vpop.permute.xlu1 %980  ;;  %5056 = vrsqrt.f32 %v4207_v59 }
0x10cd   :  { %v986_v12 = vsel %vm515_vm3, %v981_v13, 0.0  ;;  %5058 = vrsqrt.f32 %v4210_v42 }
0x10cf   :  { %v5049_v7 = vpop.eup %5048 }
0x10d0   :  { %v3816_v57 = vmul.f32 %v5049_v7, %v3779_v47  ;;  %v983_v31 = vpop.permute.xlu1 %982 }
0x10d1   :  { %v987_v9 = vsel %vm515_vm3, %v983_v31, 0.0 }
0x10d2   :  { %v3818_v22 = vsel %vm3817_vm1, %v3779_v47, %v3816_v57  ;;  %v988_v25 = vadd.f32 %v987_v9, %v986_v12 }
0x10d3   :  { %v5051_v20 = vpop.eup %5050  ;;  %v3821_v36 = vsel %vm3819_vm4, %v3820_v8, %v3818_v22 }
0x10d4   :  { %v3809_v15 = vmul.f32 %v5051_v20, %v3776_v53  ;;  %v3827_v0 = vsub.f32 10.0, %v3821_v36 }
0x10d6   :  { %v3811_v30 = vsel %vm3810_vm5, %v3776_v53, %v3809_v15  ;;  %v3833_v44 = vmax.f32 %v3827_v0, 0.0  ;;  %v5053_v53 = vpop.eup %5052  ;;  %v4239_v15 = vand.u32 2147483648, %v4210_v42 }
0x10d7   :  { %v3814_v63 = vsel %vm3812_vm6, %v3813_v23, %v3811_v30  ;;  %v917_v54 = vsub.f32 %v911_v52, %v5053_v53  ;;  %v5055_v2 = vpop.eup %5054 }
0x10d8   :  { %v3826_v19 = vsub.f32 10.0, %v3814_v63  ;;  %v4284_v35 = vsel %vm4274_vm2, %v3833_v44, 0.0  ;;  %v4221_v46 = vmul.f32 %v5055_v2, %v5929_v34 }
0x10da   :  { %v3832_v21 = vmax.f32 %v3826_v19, 0.0 }
0x10dc   :  { %v4282_v3 = vsel %vm4274_vm2, %v3832_v21, 0.0 }
0x10dd   :  { %v4283_v43 = vadd.f32 %v4282_v3, %v4281_v50 }
0x10df   :  { %v5937_v41 = vadd.f32 %v4284_v35, %v4283_v43 }
0x1103   :  { %v4046_v38 = vpop.f32.mrb[42].mxu1 }
0x1104   :  { %v4199_v17 = vmul.f32 %v4046_v38, %v4046_v38  ;;  %v4913_v11 = vpop.f32.mrb[43].mxu1  ;;  %4917 = vmatmul.mubr.msk.f32.vlgmr.msra.gmra.mrb[48].mxu0 %vm97_vm0, %v4046_v38 }
0x1106   :  { %v4211_v1 = vsel %vm3761_vm7, %v4199_v17, 0.0 }
0x1107   :  { %4212 = vadd.xlane.f32.xlu0 %v4211_v1 }
0x1194   :  { %v4213_v55 = vpop.xlane.xlu0 %4212 }
0x1195   :  { %5060 = vrsqrt.f32 %v4213_v55  ;;  %vm4243_vm11 = vcmp.eq.f32.partialorder %v4213_v55, inf  ;;  %v4246_v30 = vand.u32 2147483648, %v4213_v55  ;;  %vm4245_vm14 = vcmp.eq.f32.partialorder %v4213_v55, 0.0 }
0x11d7   :  { %v4119_v18 = vpop.f32.mrb[48].mxu0 }
0x11d8   :  { %v4200_v40 = vmul.f32 %v4119_v18, %v4119_v18  ;;  %v4918_v47 = vpop.f32.mrb[49].mxu0  ;;  %4922 = vmatmul.mubr.msk.f32.vlgmr.msra.gmra.mrb[44].mxu1 %vm97_vm0, %v4119_v18  ;;  %vm4222_vm0 = vcmp.eq.f32.partialorder %v5929_v34, inf }
0x11d9   :  { %v4223_v8 = vsel %vm4222_vm0, %v5929_v34, %v4221_v46 }
0x11da   :  { %v4214_v27 = vsel %vm3761_vm7, %v4200_v40, 0.0  ;;  %v4226_v10 = vsel %vm4224_vm8, %v4225_v4, %v4223_v8 }
0x11db   :  { %4215 = vadd.xlane.f32.xlu0 %v4214_v27  ;;  %v4262_v24 = vsub.f32 10.0, %v4226_v10 }
0x11dd   :  { %v4268_v38 = vmax.f32 %v4262_v24, 0.0 }
0x11df   :  { %v4298_v40 = vsel %vm4274_vm2, %v4268_v38, 0.0 }
0x12ab   :  { %v4192_v48 = vpop.f32.mrb[44].mxu1 }
0x12ac   :  { %v4201_v32 = vmul.f32 %v4192_v48, %v4192_v48  ;;  %v4923_v49 = vpop.f32.mrb[45].mxu1 }
0x12ae   :  { %v4217_v37 = vsel %vm3761_vm7, %v4201_v32, 0.0  ;;  %vm4229_vm7 = vcmp.eq.f32.partialorder %v4207_v59, inf }
0x12af   :  { %4218 = vadd.xlane.f32.xlu0 %v4217_v37 }
0x12c5   :  { %922 = vrot.lane.b32.xlu0 %v917_v54, %s5082_s4 }
0x12e4   :  { %888 = vadd.xlane.f32.xlu0 %v5564_v56  ;;  %v4216_v56 = vpop.xlane.xlu0 %4215 }
0x12e5   :  { %5062 = vrsqrt.f32 %v4216_v56  ;;  %vm4250_vm13 = vcmp.eq.f32.partialorder %v4216_v56, inf  ;;  %v4253_v19 = vand.u32 2147483648, %v4216_v56  ;;  %vm4252_vm15 = vcmp.eq.f32.partialorder %v4216_v56, 0.0 }
0x12e8   :  { %948 = vadd.xlane.f32.xlu0 %v5529_v16  ;;  %v5057_v16 = vpop.eup %5056 }
0x12e9   :  { %v5059_v7 = vpop.eup %5058  ;;  %v4228_v57 = vmul.f32 %v5057_v16, %v4207_v59 }
0x12ea   :  { %v5061_v61 = vpop.eup %5060 }
0x12eb   :  { %v4230_v22 = vsel %vm4229_vm7, %v4207_v59, %v4228_v57  ;;  %v4242_v45 = vmul.f32 %v5061_v61, %v4213_v55 }
0x12ec   :  { %989 = vadd.xlane.f32.xlu0 %v988_v25  ;;  %v4233_v60 = vsel %vm4231_vm10, %v4232_v29, %v4230_v22 }
0x12ed   :  { %v4244_v14 = vsel %vm4243_vm11, %v4213_v55, %v4242_v45  ;;  %v4263_v63 = vsub.f32 10.0, %v4233_v60 }
0x12ee   :  { %v4247_v58 = vsel %vm4245_vm14, %v4246_v30, %v4244_v14 }
0x12ef   :  { %v4265_v35 = vsub.f32 10.0, %v4247_v58  ;;  %v4269_v17 = vmax.f32 %v4263_v63, 0.0 }
0x12f0   :  { %2836 = vadd.xlane.f32.xlu0 %v5780_v39  ;;  %v4235_v39 = vmul.f32 %v5059_v7, %v4210_v42 }
0x12f1   :  { %v4271_v18 = vmax.f32 %v4265_v35, 0.0  ;;  %v4299_v47 = vsel %vm4274_vm2, %v4269_v17, 0.0 }
0x12f2   :  { %v4237_v20 = vsel %vm4236_vm9, %v4210_v42, %v4235_v39  ;;  %v4300_v37 = vadd.f32 %v4299_v47, %v4298_v40 }
0x12f3   :  { %v4240_v0 = vsel %vm4238_vm12, %v4239_v15, %v4237_v20  ;;  %v4303_v6 = vsel %vm4274_vm2, %v4271_v18, 0.0 }
0x12f4   :  { %3743 = vadd.xlane.f32.xlu0 %v5918_v62  ;;  %v5063_v62 = vpop.eup %5062  ;;  %v4264_v44 = vsub.f32 10.0, %v4240_v0 }
0x12f5   :  { %v4249_v36 = vmul.f32 %v5063_v62, %v4216_v56 }
0x12f6   :  { %v4270_v1 = vmax.f32 %v4264_v44, 0.0 }
0x12f7   :  { %v4251_v34 = vsel %vm4250_vm13, %v4216_v56, %v4249_v36 }
0x12f8   :  { %v4254_v3 = vsel %vm4252_vm15, %v4253_v19, %v4251_v34  ;;  %v4301_v32 = vsel %vm4274_vm2, %v4270_v1, 0.0 }
0x12f9   :  { %v4266_v11 = vsub.f32 10.0, %v4254_v3  ;;  %v4302_v53 = vadd.f32 %v4301_v32, %v4300_v37 }
0x12fb   :  { %v4272_v28 = vmax.f32 %v4266_v11, 0.0  ;;  %v4304_v31 = vadd.f32 %v4303_v6, %v4302_v53 }
0x12fd   :  { %v4305_v13 = vsel %vm4274_vm2, %v4272_v28, 0.0 }
0x133c   :  { %v4219_v23 = vpop.xlane.xlu0 %4218 }
0x133d   :  { %5064 = vrsqrt.f32 %v4219_v23  ;;  %v4260_v49 = vand.u32 2147483648, %v4219_v23  ;;  %vm4259_vm1 = vcmp.eq.f32.partialorder %v4219_v23, 0.0 }
0x1340   :  { %v923_v21 = vpop.permute.xlu0 %922 }
0x1341   :  { %v927_v50 = vsel %vm515_vm3, %v923_v21, 0.0  ;;  %vm4257_vm3 = vcmp.eq.f32.partialorder %v4219_v23, inf }
0x1342   :  { %v928_v43 = vadd.f32 %v927_v50, %v926_v26 }
0x1344   :  { %929 = vadd.xlane.f32.xlu1 %v928_v43 }
0x1347   :  { %v5065_v27 = vpop.eup %5064 }
0x1348   :  { %v4256_v48 = vmul.f32 %v5065_v27, %v4219_v23  ;;  %1119 = vadd.xlane.f32.xlu1 %v5568_v5  ;;  %v4306_v5 = vadd.f32 %v4305_v13, %v4304_v31 }
0x134a   :  { %v4258_v51 = vsel %vm4257_vm3, %v4219_v23, %v4256_v48 }
0x134b   :  { %v4261_v52 = vsel %vm4259_vm1, %v4260_v49, %v4258_v51 }
0x134c   :  { %3098 = vadd.xlane.f32.xlu1 %v5819_v33  ;;  %v4267_v54 = vsub.f32 10.0, %v4261_v52 }
0x134e   :  { %v4273_v9 = vmax.f32 %v4267_v54, 0.0 }
0x1350   :  { %4286 = vadd.xlane.f32.xlu1 %v5937_v41  ;;  %v4307_v12 = vsel %vm4274_vm2, %v4273_v9, 0.0 }
0x1351   :  { %v4308_v25 = vadd.f32 %v4307_v12, %v4306_v5 }
0x1353   :  { %4309 = vadd.xlane.f32.xlu0 %v4308_v25 }
0x1371   :  { %v889_v59 = vpop.xlane.xlu0 %888 }
0x1372   :  { %v890_v42 = vrot.slane %v889_v59, 4 }
0x1374   :  { %v891_v55 = vadd.f32 %v890_v42, %v889_v59 }
0x1375   :  { %v949_v33 = vpop.xlane.xlu0 %948 }
0x1376   :  { %v892_v56 = vrot.slane %v891_v55, 2  ;;  %v950_v61 = vrot.slane %v949_v33, 4 }
0x1378   :  { %v893_v2 = vadd.f32 %v892_v56, %v891_v55  ;;  %v951_v39 = vadd.f32 %v950_v61, %v949_v33 }
0x1379   :  { %v990_v46 = vpop.xlane.xlu0 %989 }
0x137a   :  { %v894_v16 = vrot.slane %v893_v2, 1  ;;  %v991_v41 = vrot.slane %v990_v46, 4  ;;  %v952_v22 = vrot.slane %v951_v39, 2 }
0x137c   :  { %v895_v7 = vadd.f32 %v894_v16, %v893_v2  ;;  %v992_v4 = vadd.f32 %v991_v41, %v990_v46  ;;  %v953_v30 = vadd.f32 %v952_v22, %v951_v39 }
0x137d   :  { %v2837_v57 = vpop.xlane.xlu0 %2836 }
0x137e   :  { %5000 = vpush %v895_v7  ;;  %v2838_v62 = vrot.slane %v2837_v57, 4  ;;  %v993_v36 = vrot.slane %v992_v4, 2  ;;  %v954_v44 = vrot.slane %v953_v30, 1 }
0x1380   :  { %v2839_v45 = vadd.f32 %v2838_v62, %v2837_v57  ;;  %v994_v24 = vadd.f32 %v993_v36, %v992_v4  ;;  %v955_v18 = vadd.f32 %v954_v44, %v953_v30 }
0x1381   :  { %v3744_v8 = vpop.xlane.xlu0 %3743 }
0x1382   :  { %v3745_v29 = vrot.slane %v3744_v8, 4  ;;  %v2840_v60 = vrot.slane %v2839_v45, 2  ;;  %v995_v35 = vrot.slane %v994_v24, 1 }
0x1384   :  { %v3746_v23 = vadd.f32 %v3745_v29, %v3744_v8  ;;  %v2841_v26 = vadd.f32 %v2840_v60, %v2839_v45  ;;  %v996_v28 = vadd.f32 %v995_v35, %v994_v24 }
0x1386   :  { %v3747_v19 = vrot.slane %v3746_v23, 2  ;;  %v2842_v40 = vrot.slane %v2841_v26, 1 }
0x1388   :  { %v3748_v47 = vadd.f32 %v3747_v19, %v3746_v23  ;;  %v2843_v53 = vadd.f32 %v2842_v40, %v2841_v26 }
0x138a   :  { %v3749_v54 = vrot.slane %v3748_v47, 1 }
0x138c   :  { %v3750_v59 = vadd.f32 %v3749_v54, %v3748_v47 }
0x13af   :  { %s5001_s15 = spop %5000 }
0x13b0   :  { %s897_s4 = smul.f32 0.0625, %s5001_s15 }
0x13d1   :  { %v930_v20 = vpop.xlane.xlu1 %929 }
0x13d2   :  { %v931_v15 = vrot.slane %v930_v20, 4 }
0x13d4   :  { %v932_v10 = vadd.f32 %v931_v15, %v930_v20 }
0x13d5   :  { %v1120_v14 = vpop.xlane.xlu1 %1119 }
0x13d6   :  { %v933_v0 = vrot.slane %v932_v10, 2  ;;  %v1121_v34 = vrot.slane %v1120_v14, 4 }
0x13d8   :  { %v1122_v63 = vadd.f32 %v1121_v34, %v1120_v14  ;;  %v934_v58 = vadd.f32 %v933_v0, %v932_v10 }
0x13d9   :  { %v3099_v21 = vpop.xlane.xlu1 %3098 }
0x13da   :  { %v1123_v50 = vrot.slane %v1122_v63, 2  ;;  %v3100_v3 = vrot.slane %v3099_v21, 4  ;;  %v935_v43 = vrot.slane %v934_v58, 1 }
0x13dc   :  { %v3101_v38 = vadd.f32 %v3100_v3, %v3099_v21  ;;  %v936_v17 = vadd.f32 %v935_v43, %v934_v58  ;;  %v1124_v11 = vadd.f32 %v1123_v50, %v1122_v63 }
0x13dd   :  { %v4287_v1 = vpop.xlane.xlu1 %4286 }
0x13de   :  { %v3102_v27 = vrot.slane %v3101_v38, 2  ;;  %v4288_v48 = vrot.slane %v4287_v1, 4  ;;  %5002 = vpush %v936_v17  ;;  %v1125_v32 = vrot.slane %v1124_v11, 1 }
0x13df   :  { %5004 = vpush %v955_v18 }
0x13e0   :  { %v4289_v49 = vadd.f32 %v4288_v48, %v4287_v1  ;;  %5006 = vpush %v996_v28  ;;  %v4310_v37 = vpop.xlane.xlu0 %4309  ;;  %v1126_v51 = vadd.f32 %v1125_v32, %v1124_v11  ;;  %v3103_v6 = vadd.f32 %v3102_v27, %v3101_v38 }
0x13e1   :  { %v4311_v52 = vrot.slane %v4310_v37, 4 }
0x13e2   :  { %v4290_v13 = vrot.slane %v4289_v49, 2  ;;  %5008 = vpush %v1126_v51  ;;  %v3104_v31 = vrot.slane %v3103_v6, 1 }
0x13e3   :  { %v4312_v9 = vadd.f32 %v4311_v52, %v4310_v37  ;;  %5010 = vpush %v2843_v53 }
0x13e4   :  { %v4291_v5 = vadd.f32 %v4290_v13, %v4289_v49  ;;  %v3105_v12 = vadd.f32 %v3104_v31, %v3103_v6 }
0x13e5   :  { %v4313_v25 = vrot.slane %v4312_v9, 2 }
0x13e6   :  { %5012 = vpush %v3105_v12  ;;  %v4292_v42 = vrot.slane %v4291_v5, 1 }
0x13e7   :  { %v4314_v55 = vadd.f32 %v4313_v25, %v4312_v9  ;;  %5014 = vpush %v3750_v59 }
0x13e8   :  { %v4293_v56 = vadd.f32 %v4292_v42, %v4291_v5 }
0x13e9   :  { %v4315_v2 = vrot.slane %v4314_v55, 1 }
0x13ea   :  { %5016 = vpush %v4293_v56 }
0x13eb   :  { %v4316_v16 = vadd.f32 %v4315_v2, %v4314_v55 }
0x13ed   :  { %5018 = vpush %v4316_v16 }
0x140f   :  { %s5003_s2 = spop %5002 }
0x1410   :  { %s938_s3 = smul.f32 -0.5, %s5003_s2  ;;  %s5005_s18 = spop %5004 }
0x1411   :  { %s957_s12 = smul.f32 0.0625, %s5005_s18  ;;  %s5007_s7 = spop %5006 }
0x1412   :  { %s939_s21 = smul.f32 0.0625, %s938_s3 }
0x1413   :  { %s998_s19 = smul.f32 -0.5, %s5007_s7  ;;  %s5009_s8 = spop %5008 }
0x1414   :  { %s940_s30 = sadd.f32 %s939_s21, %s897_s4  ;;  %s1130_s9 = smul.f32 0.03125, %s5009_s8 }
0x1415   :  { %s999_s28 = smul.f32 0.0625, %s998_s19  ;;  %s5011_s17 = spop %5010 }
0x1416   :  { %4323 = sst [smem:[#allocation2]] %s940_s30  ;;  %s2847_s0 = smul.f32 0.0052083335, %s5011_s17 }
0x1417   :  { %s1000_s10 = sadd.f32 %s999_s28, %s957_s12  ;;  %s5013_s13 = spop %5012 }
0x1418   :  { %4331 = sst [smem:[#allocation2 + $0x4]] %s1130_s9  ;;  %s3109_s22 = smul.f32 0.0026041667, %s5013_s13 }
0x1419   :  { %4325 = sst [smem:[#allocation2 + $0x1]] %s1000_s10  ;;  %s5015_s29 = spop %5014 }
0x141a   :  { %s3110_s20 = sadd.f32 %s3109_s22, %s2847_s0  ;;  %s3754_s1 = smul.f32 0.0026041667, %s5015_s29 }
0x141b   :  { %s5017_s14 = spop %5016 }
0x141c   :  { %4327 = sst [smem:[#allocation2 + $0x2]] %s3110_s20  ;;  %s4297_s6 = smul.f32 0.020833334, %s5017_s14 }
0x141d   :  { %4333 = sst [smem:[#allocation2 + $0x5]] %s3754_s1 }
0x141e   :  { %s5019_s16 = spop %5018 }
0x141f   :  { %s4320_s23 = smul.f32 0.020833334, %s5019_s16 }
0x1421   :  { %s4321_s24 = sadd.f32 %s4320_s23, %s4297_s6 }
0x1423   :  { %4329 = sst [smem:[#allocation2 + $0x3]] %s4321_s24 }
0x1424   :  { %5078 = shalt.err (!%p5075_p4)
}
0x1425   :  { %s5086_s15 = smov [#allocation2]  }
0x1426   :  { %4347 = dma.smem_to_vmem %s5086_s15, 16, %s4345_s25, [#allocation3]  }
0x1427   :  { %5079 = dma.done.wait [#allocation3], 16  }
0x1428   :  { %5080 = vsyncadd [#allocation3], 4294967280 }
0x1429   :  { %4351 = sfence }
0x142a   :  { %4352 = vsyncpa [#allocation3], 1 }

</bundles_post_ra>
